<compile_context>
chip_gen: v7x
topology: tpu7x:2x2x1
jax: 0.10.0
libtpu: 0.0.40
codegen_flags: <defaults>
</compile_context>

<pallas_src>
import functools

import jax
import jax.numpy as jnp
from jax.experimental import pallas as pl
from jax.experimental.pallas import tpu as pltpu

LANE = 128
VMEM_LIMIT = 48 << 20  # safe on v7x (64 MiB physical); plenty on v5e/v6e.


# ----------------------------------------------------------------------------
# Kernel 1: per-node feature transform, fused W_l || W_r matmul
#   Y = X @ [W_l | W_r]   (bf16 in, f32 acc)
#   XW_l = Y[:, :f_out]            (bf16 out, feeds the big A-matmul)
#   SELF = Y[:, f_out:] + b        (bf16 out, added in the aggregate epilogue)
# ----------------------------------------------------------------------------
def _transform_kernel(x_ref, w_ref, b_ref, xwl_ref, self_ref, *, f_out):
    y = jnp.dot(x_ref[...], w_ref[...], preferred_element_type=jnp.float32)
    xwl_ref[...] = y[:, :f_out].astype(xwl_ref.dtype)
    self_ref[...] = (y[:, f_out:] + b_ref[...]).astype(self_ref.dtype)


def sage_transform(x, w_cat, b, *, tm):
    n, f_in = x.shape
    two_f_out = w_cat.shape[1]
    f_out = two_f_out // 2
    kernel = functools.partial(_transform_kernel, f_out=f_out)
    return pl.pallas_call(
        kernel,
        out_shape=(
            jax.ShapeDtypeStruct((n, f_out), jnp.bfloat16),  # XW_l
            jax.ShapeDtypeStruct((n, f_out), jnp.bfloat16),  # SELF = X@W_r + b
        ),
        grid=(n // tm,),
        in_specs=[
            pl.BlockSpec((tm, f_in), lambda i: (i, 0)),
            pl.BlockSpec((f_in, two_f_out), lambda i: (0, 0)),
            pl.BlockSpec((1, f_out), lambda i: (0, 0)),
        ],
        out_specs=[
            pl.BlockSpec((tm, f_out), lambda i: (i, 0)),
            pl.BlockSpec((tm, f_out), lambda i: (i, 0)),
        ],
        compiler_params=pltpu.CompilerParams(
            dimension_semantics=("parallel",),
            vmem_limit_bytes=VMEM_LIMIT,
        ),
    )(x, w_cat, b)


# ----------------------------------------------------------------------------
# Kernel 2: mean aggregation as a tiled matmul with a K-reduction grid axis
#   acc[i_tile] = sum_k A_counts[i_tile, k_tile] @ XW_l[k_tile]   (f32 acc)
#   out[i_tile] = relu?( inv_deg[i_tile] * acc[i_tile] + SELF[i_tile] )
# ----------------------------------------------------------------------------
def _aggregate_kernel(
    a_ref, xwl_ref, self_ref, invdeg_ref, o_ref, acc_ref, *, apply_relu
):
    k = pl.program_id(1)

    @pl.when(k == 0)
    def _():
        acc_ref[...] = jnp.zeros_like(acc_ref)

    # int8 edge counts -> bf16 (exact for small integer counts), bf16 MXU matmul.
    a = a_ref[...].astype(jnp.bfloat16)
    acc_ref[...] += jnp.dot(a, xwl_ref[...], preferred_element_type=jnp.float32)

    @pl.when(k == pl.num_programs(1) - 1)
    def _():
        out = acc_ref[...] * invdeg_ref[...] + self_ref[...].astype(jnp.float32)
        if apply_relu:
            out = jnp.maximum(out, 0.0)
        o_ref[...] = out.astype(o_ref.dtype)


def sage_aggregate(a_i8, xwl, self_term, inv_deg, *, apply_relu, out_dtype, tm, tk):
    n = a_i8.shape[0]
    f_out = xwl.shape[1]
    grid = (n // tm, n // tk)
    kernel = functools.partial(_aggregate_kernel, apply_relu=apply_relu)
    flops = 2 * n * n * f_out + 3 * n * f_out
    # A read once; XW_l re-streamed once per row tile; SELF/inv_deg/out once per row.
    bytes_accessed = (
        n * n * 1
        + n * f_out * 2 * (n // tm)
        + n * f_out * 2
        + n * 4
        + n * f_out * jnp.dtype(out_dtype).itemsize
    )
    return pl.pallas_call(
        kernel,
        out_shape=jax.ShapeDtypeStruct((n, f_out), out_dtype),
        grid_spec=pltpu.PrefetchScalarGridSpec(
            num_scalar_prefetch=0,
            grid=grid,
            in_specs=[
                pl.BlockSpec((tm, tk), lambda i, k: (i, k)),      # A counts tile (int8)
                pl.BlockSpec((tk, f_out), lambda i, k: (k, 0)),   # XW_l k-tile (bf16)
                pl.BlockSpec((tm, f_out), lambda i, k: (i, 0)),   # SELF i-tile (bf16)
                pl.BlockSpec((tm, 1), lambda i, k: (i, 0)),       # inv_deg i-tile (f32)
            ],
            out_specs=pl.BlockSpec((tm, f_out), lambda i, k: (i, 0)),
            # f32 accumulator kept: non-final layers emit bf16 h, so accumulating
            # directly in o_ref would round per k-step. Footprint: tm*f_out*4 B.
            scratch_shapes=[pltpu.VMEM((tm, f_out), jnp.float32)],
        ),
        compiler_params=pltpu.CompilerParams(
            dimension_semantics=("parallel", "arbitrary"),
            vmem_limit_bytes=VMEM_LIMIT,
        ),
        cost_estimate=pl.CostEstimate(
            flops=flops, transcendentals=0, bytes_accessed=int(bytes_accessed)
        ),
    )(a_i8, xwl, self_term, inv_deg)


# ----------------------------------------------------------------------------
# Glue: padding, tiling choice, one-time prep, forward
# ----------------------------------------------------------------------------
def _round_up(v, m):
    return (v + m - 1) // m * m


def _pad2d(arr, rows, cols):
    r, c = arr.shape
    return jnp.pad(arr, ((0, rows - r), (0, cols - c)))


def choose_tiling(n, *, tm_req=256, tk_req=512):
    """Pick (n_pad, tm, tk). tm/tk are powers of two >= 256 clamped to n_pad."""
    n_pad = _round_up(n, 256)
    tm = min(tm_req, n_pad)
    tk = min(tk_req, n_pad)
    n_pad = _round_up(n_pad, max(tm, tk))
    assert n_pad % tm == 0 and n_pad % tk == 0
    return n_pad, tm, tk


def init_params(key, nfeat, nhid, nclass, nlayer=3):
    dims = [(nfeat, nhid)] + [(nhid, nhid)] * (nlayer - 2) + [(nhid, nclass)]
    params = []
    for fi, fo in dims:
        key, k1, k2, k3 = jax.random.split(key, 4)
        scale = 1.0 / jnp.sqrt(jnp.float32(fi))
        params.append(
            dict(
                w_l=jax.random.uniform(k1, (fi, fo), jnp.float32, -scale, scale),
                w_r=jax.random.uniform(k2, (fi, fo), jnp.float32, -scale, scale),
                b=jax.random.uniform(k3, (1, fo), jnp.float32, -scale, scale),
            )
        )
    return params


def prepare_params(params):
    """One-time: pad to lane multiples, fuse W_l||W_r, cast weights to bf16."""
    prepped = []
    for p in params:
        fi, fo = p["w_l"].shape
        fi_p, fo_p = _round_up(fi, LANE), _round_up(fo, LANE)
        w_cat = jnp.concatenate(
            [_pad2d(p["w_l"], fi_p, fo_p), _pad2d(p["w_r"], fi_p, fo_p)], axis=1
        ).astype(jnp.bfloat16)
        b = _pad2d(p["b"], 1, fo_p)  # bias kept f32 (tiny, added to f32 slice)
        prepped.append(dict(w_cat=w_cat, b=b))
    return prepped


def build_adjacency(edge_index, num_nodes):
    """Dense edge-count matrix (f32) for the reference + degree info."""
    src, dst = edge_index[0], edge_index[1]
    counts = jnp.zeros((num_nodes, num_nodes), jnp.float32).at[dst, src].add(1.0)
    deg = counts.sum(axis=1, keepdims=True)
    inv_deg = 1.0 / jnp.maximum(deg, 1.0)
    return counts, inv_deg


def prepare_adjacency(counts, inv_deg, n_pad):
    """One-time: pad and cast A to int8 (exact small-integer counts)."""
    a_i8 = _pad2d(counts, n_pad, n_pad).astype(jnp.int8)
    inv_deg_p = _pad2d(inv_deg, n_pad, 1)
    return a_i8, inv_deg_p


@functools.partial(jax.jit, static_argnames=("nclass", "tm", "tk"))
def graphsagex_forward(prepped_params, x, a_i8, inv_deg, *, nclass, tm, tk):
    n = x.shape[0]
    n_pad = a_i8.shape[0]
    nlayers = len(prepped_params)

    # Node features: pad once, cast to bf16 (intermediate h stays bf16).
    h = _pad2d(x, n_pad, _round_up(x.shape[1], LANE)).astype(jnp.bfloat16)

    for li, p in enumerate(prepped_params):
        last = li == nlayers - 1
        # F.dropout with training=False is the identity (eval mode).
        xwl, self_t = sage_transform(h, p["w_cat"], p["b"], tm=tm)
        # NOTE: padded node rows of SELF equal b (0@W_r + b), so padded rows of
        # h carry relu(b).  Harmless: A's padded columns are zero and padded
        # rows are dropped by the final slice.
        h = sage_aggregate(
            a_i8, xwl, self_t, inv_deg,
            apply_relu=not last,
            out_dtype=jnp.float32 if last else jnp.bfloat16,
            tm=tm, tk=tk,
        )
    return h[:n, :nclass]


def reference_forward(params, x, a_norm):
    """Pure-JAX f32 reference matching PyG SAGEConv(mean) semantics."""
    h = x
    nlayers = len(params)
    for li, p in enumerate(params):
        aggr = a_norm @ h
        out = aggr @ p["w_l"] + h @ p["w_r"] + p["b"]
        h = jnp.maximum(out, 0.0) if li != nlayers - 1 else out
    return h


if __name__ == "__main__":
    NUM_NODES = 256
    NFEAT, NHID, NCLASS = 32, 64, 16
    NLAYER = 3
    NUM_EDGES = 1024

    key = jax.random.PRNGKey(0)
    k_x, k_src, k_dst, k_params = jax.random.split(key, 4)

    # Node features (N, F) and a random directed edge_index (2, E).
    x = jax.random.normal(k_x, (NUM_NODES, NFEAT), jnp.float32)
    src = jax.random.randint(k_src, (NUM_EDGES,), 0, NUM_NODES)
    dst = jax.random.randint(k_dst, (NUM_EDGES,), 0, NUM_NODES)
    edge_index = jnp.stack([src, dst], axis=0)

    params = init_params(k_params, NFEAT, NHID, NCLASS, NLAYER)

    # ---- one-time setup (hoisted out of the per-call forward) ----
    n_pad, tm, tk = choose_tiling(NUM_NODES)
    counts, inv_deg = build_adjacency(edge_index, NUM_NODES)
    a_i8, inv_deg_p = prepare_adjacency(counts, inv_deg, n_pad)
    prepped = prepare_params(params)

    out = jax.block_until_ready(
        graphsagex_forward(prepped, x, a_i8, inv_deg_p, nclass=NCLASS, tm=tm, tk=tk)
    )
    assert out.shape == (NUM_NODES, NCLASS), out.shape

    # Sanity check vs pure-JAX f32 reference.  Tolerance accounts for the bf16
    # X / W / h path (accumulation is f32; the adjacency path is exact int8+f32).
    a_norm = counts * inv_deg
    ref = reference_forward(params, x, a_norm)
    scale = float(jnp.max(jnp.abs(ref)))
    max_err = float(jnp.max(jnp.abs(out.astype(jnp.float32) - ref)))
    assert max_err < max(5e-2, 2e-2 * scale), f"max abs error {max_err} (scale {scale})"

    print("KERNEL_OK")
</pallas_src>

<mosaic_0001>
module attributes {stable_mosaic.version = 11 : i64} {
  func.func @_transform_kernel(%arg0: i32, %arg1: memref<256x128xbf16, #tpu.memory_space<vmem>>, %arg2: memref<128x256xbf16, #tpu.memory_space<vmem>>, %arg3: memref<1x128xf32, #tpu.memory_space<vmem>>, %arg4: memref<256x128xbf16, #tpu.memory_space<vmem>>, %arg5: memref<256x128xbf16, #tpu.memory_space<vmem>>) attributes {dimension_semantics = [#tpu.dimension_semantics<parallel>], iteration_bounds = array<i64: 1>, scalar_prefetch = 0 : i64, scratch_operands = 0 : i64, tpu.core_type = #tpu.core_type<tc>, window_params = [{transform_indices = @transform_0, window_bounds = array<i64: 256, 128>}, {pipeline_mode = #tpu.pipeline_mode<synchronous>, transform_indices = @transform_1, window_bounds = array<i64: 128, 256>}, {pipeline_mode = #tpu.pipeline_mode<synchronous>, transform_indices = @transform_2, window_bounds = array<i64: 1, 128>}, {transform_indices = @transform_3, window_bounds = array<i64: 256, 128>}, {transform_indices = @transform_4, window_bounds = array<i64: 256, 128>}]} {
    %c0 = arith.constant 0 : index
    %c0_0 = arith.constant 0 : index
    %0 = vector.load %arg1[%c0, %c0_0] : memref<256x128xbf16, #tpu.memory_space<vmem>>, vector<256x128xbf16>
    %c0_1 = arith.constant 0 : index
    %c0_2 = arith.constant 0 : index
    %1 = vector.load %arg2[%c0_1, %c0_2] : memref<128x256xbf16, #tpu.memory_space<vmem>>, vector<128x256xbf16>
    %cst = arith.constant dense<0.000000e+00> : vector<256x256xf32>
    %2 = tpu.matmul %0, %1, %cst {dimension_numbers = #tpu.dot_dimension_numbers<[1], [0], [0], [1], [0, 0, 1, 1], [], []>} : vector<256x128xbf16>, vector<128x256xbf16>, vector<256x256xf32> -> vector<256x256xf32>
    %3 = vector.extract_strided_slice %2 {offsets = [0, 0], sizes = [256, 128], strides = [1, 1]} : vector<256x256xf32> to vector<256x128xf32>
    %4 = arith.truncf %3 : vector<256x128xf32> to vector<256x128xbf16>
    %c0_3 = arith.constant 0 : index
    %c0_4 = arith.constant 0 : index
    %5 = vector.load %arg4[%c0_3, %c0_4] : memref<256x128xbf16, #tpu.memory_space<vmem>>, vector<256x128xbf16>
    tpu.vector_store %arg4[%c0_3, %c0_4], %4 {strides = array<i32>} : memref<256x128xbf16, #tpu.memory_space<vmem>>, vector<256x128xbf16>,
    %6 = vector.extract_strided_slice %2 {offsets = [0, 128], sizes = [256, 128], strides = [1, 1]} : vector<256x256xf32> to vector<256x128xf32>
    %c0_5 = arith.constant 0 : index
    %c0_6 = arith.constant 0 : index
    %7 = vector.load %arg3[%c0_5, %c0_6] : memref<1x128xf32, #tpu.memory_space<vmem>>, vector<1x128xf32>
    %8 = vector.broadcast %7 : vector<1x128xf32> to vector<256x128xf32>
    %9 = arith.addf %6, %8 : vector<256x128xf32>
    %10 = arith.truncf %9 : vector<256x128xf32> to vector<256x128xbf16>
    %c0_7 = arith.constant 0 : index
    %c0_8 = arith.constant 0 : index
    %11 = vector.load %arg5[%c0_7, %c0_8] : memref<256x128xbf16, #tpu.memory_space<vmem>>, vector<256x128xbf16>
    tpu.vector_store %arg5[%c0_7, %c0_8], %10 {strides = array<i32>} : memref<256x128xbf16, #tpu.memory_space<vmem>>, vector<256x128xbf16>,
    return
  }
  func.func @transform_0(%arg0: i32) -> (i32, i32) {
    %c0_i32 = arith.constant 0 : i32
    %c0_i32_0 = arith.constant 0 : i32
    return %arg0, %c0_i32 : i32, i32
  }
  func.func @transform_1(%arg0: i32) -> (i32, i32) {
    %c0_i32 = arith.constant 0 : i32
    %c0_i32_0 = arith.constant 0 : i32
    %c0_i32_1 = arith.constant 0 : i32
    return %c0_i32, %c0_i32_0 : i32, i32
  }
  func.func @transform_2(%arg0: i32) -> (i32, i32) {
    %c0_i32 = arith.constant 0 : i32
    %c0_i32_0 = arith.constant 0 : i32
    %c0_i32_1 = arith.constant 0 : i32
    return %c0_i32, %c0_i32_0 : i32, i32
  }
  func.func @transform_3(%arg0: i32) -> (i32, i32) {
    %c0_i32 = arith.constant 0 : i32
    %c0_i32_0 = arith.constant 0 : i32
    return %arg0, %c0_i32 : i32, i32
  }
  func.func @transform_4(%arg0: i32) -> (i32, i32) {
    %c0_i32 = arith.constant 0 : i32
    %c0_i32_0 = arith.constant 0 : i32
    return %arg0, %c0_i32 : i32, i32
  }
}

module attributes {stable_mosaic.version = 11 : i64} {
  func.func @_aggregate_kernel(%arg0: i32, %arg1: i32, %arg2: memref<256x256xi8, #tpu.memory_space<vmem>>, %arg3: memref<256x128xbf16, #tpu.memory_space<vmem>>, %arg4: memref<256x128xbf16, #tpu.memory_space<vmem>>, %arg5: memref<256x1xf32, #tpu.memory_space<vmem>>, %arg6: memref<256x128xbf16, #tpu.memory_space<vmem>>, %arg7: memref<256x128xf32, #tpu.memory_space<vmem>>) attributes {dimension_semantics = [#tpu.dimension_semantics<parallel>, #tpu.dimension_semantics<arbitrary>], iteration_bounds = array<i64: 1, 1>, scalar_prefetch = 0 : i64, scratch_operands = 1 : i64, tpu.core_type = #tpu.core_type<tc>, window_params = [{transform_indices = @transform_0, window_bounds = array<i64: 256, 256>}, {transform_indices = @transform_1, window_bounds = array<i64: 256, 128>}, {transform_indices = @transform_2, window_bounds = array<i64: 256, 128>}, {transform_indices = @transform_3, window_bounds = array<i64: 256, 1>}, {transform_indices = @transform_4, window_bounds = array<i64: 256, 128>}]} {
    %c0_i32 = arith.constant 0 : i32
    %0 = arith.cmpi eq, %arg1, %c0_i32 : i32
    %1 = arith.extui %0 : i1 to i32
    %c0_i32_0 = arith.constant 0 : i32
    %2 = arith.cmpi ne, %1, %c0_i32_0 : i32
    scf.if %2 {
      %cst_10 = arith.constant 0.000000e+00 : f32
      %13 = vector.broadcast %cst_10 : f32 to vector<256x128xf32>
      %c0_11 = arith.constant 0 : index
      %c0_12 = arith.constant 0 : index
      %14 = vector.load %arg7[%c0_11, %c0_12] : memref<256x128xf32, #tpu.memory_space<vmem>>, vector<256x128xf32>
      tpu.vector_store %arg7[%c0_11, %c0_12], %13 {strides = array<i32>} : memref<256x128xf32, #tpu.memory_space<vmem>>, vector<256x128xf32>,
    } else {
    }
    %c0 = arith.constant 0 : index
    %c0_1 = arith.constant 0 : index
    %3 = vector.load %arg2[%c0, %c0_1] : memref<256x256xi8, #tpu.memory_space<vmem>>, vector<256x256xi8>
    %4 = arith.sitofp %3 : vector<256x256xi8> to vector<256x256xbf16>
    %c0_2 = arith.constant 0 : index
    %c0_3 = arith.constant 0 : index
    %5 = vector.load %arg7[%c0_2, %c0_3] : memref<256x128xf32, #tpu.memory_space<vmem>>, vector<256x128xf32>
    %c0_4 = arith.constant 0 : index
    %c0_5 = arith.constant 0 : index
    %6 = vector.load %arg3[%c0_4, %c0_5] : memref<256x128xbf16, #tpu.memory_space<vmem>>, vector<256x128xbf16>
    %cst = arith.constant dense<0.000000e+00> : vector<256x128xf32>
    %7 = tpu.matmul %4, %6, %cst {dimension_numbers = #tpu.dot_dimension_numbers<[1], [0], [0], [1], [0, 0, 1, 1], [], []>} : vector<256x256xbf16>, vector<256x128xbf16>, vector<256x128xf32> -> vector<256x128xf32>
    %8 = arith.addf %5, %7 : vector<256x128xf32>
    %c0_6 = arith.constant 0 : index
    %c0_7 = arith.constant 0 : index
    %9 = vector.load %arg7[%c0_6, %c0_7] : memref<256x128xf32, #tpu.memory_space<vmem>>, vector<256x128xf32>
    tpu.vector_store %arg7[%c0_6, %c0_7], %8 {strides = array<i32>} : memref<256x128xf32, #tpu.memory_space<vmem>>, vector<256x128xf32>,
    %c0_i32_8 = arith.constant 0 : i32
    %10 = arith.cmpi eq, %arg1, %c0_i32_8 : i32
    %11 = arith.extui %10 : i1 to i32
    %c0_i32_9 = arith.constant 0 : i32
    %12 = arith.cmpi ne, %11, %c0_i32_9 : i32
    scf.if %12 {
      %c0_10 = arith.constant 0 : index
      %c0_11 = arith.constant 0 : index
      %13 = vector.load %arg7[%c0_10, %c0_11] : memref<256x128xf32, #tpu.memory_space<vmem>>, vector<256x128xf32>
      %c0_12 = arith.constant 0 : index
      %c0_13 = arith.constant 0 : index
      %14 = vector.load %arg5[%c0_12, %c0_13] : memref<256x1xf32, #tpu.memory_space<vmem>>, vector<256x1xf32>
      %15 = vector.broadcast %14 : vector<256x1xf32> to vector<256x128xf32>
      %16 = arith.mulf %13, %15 : vector<256x128xf32>
      %c0_14 = arith.constant 0 : index
      %c0_15 = arith.constant 0 : index
      %17 = vector.load %arg4[%c0_14, %c0_15] : memref<256x128xbf16, #tpu.memory_space<vmem>>, vector<256x128xbf16>
      %18 = arith.extf %17 : vector<256x128xbf16> to vector<256x128xf32>
      %19 = arith.addf %16, %18 : vector<256x128xf32>
      %cst_16 = arith.constant 0.000000e+00 : f32
      %20 = vector.broadcast %cst_16 : f32 to vector<256x128xf32>
      %21 = arith.maximumf %19, %20 : vector<256x128xf32>
      %22 = arith.truncf %21 : vector<256x128xf32> to vector<256x128xbf16>
      %c0_17 = arith.constant 0 : index
      %c0_18 = arith.constant 0 : index
      %23 = vector.load %arg6[%c0_17, %c0_18] : memref<256x128xbf16, #tpu.memory_space<vmem>>, vector<256x128xbf16>
      tpu.vector_store %arg6[%c0_17, %c0_18], %22 {strides = array<i32>} : memref<256x128xbf16, #tpu.memory_space<vmem>>, vector<256x128xbf16>,
    } else {
    }
    return
  }
  func.func @transform_0(%arg0: i32, %arg1: i32) -> (i32, i32) {
    %c0_i32 = arith.constant 0 : i32
    return %arg0, %arg1 : i32, i32
  }
  func.func @transform_1(%arg0: i32, %arg1: i32) -> (i32, i32) {
    %c0_i32 = arith.constant 0 : i32
    %c0_i32_0 = arith.constant 0 : i32
    return %arg1, %c0_i32 : i32, i32
  }
  func.func @transform_2(%arg0: i32, %arg1: i32) -> (i32, i32) {
    %c0_i32 = arith.constant 0 : i32
    %c0_i32_0 = arith.constant 0 : i32
    return %arg0, %c0_i32 : i32, i32
  }
  func.func @transform_3(%arg0: i32, %arg1: i32) -> (i32, i32) {
    %c0_i32 = arith.constant 0 : i32
    %c0_i32_0 = arith.constant 0 : i32
    return %arg0, %c0_i32 : i32, i32
  }
  func.func @transform_4(%arg0: i32, %arg1: i32) -> (i32, i32) {
    %c0_i32 = arith.constant 0 : i32
    %c0_i32_0 = arith.constant 0 : i32
    return %arg0, %c0_i32 : i32, i32
  }
}

module attributes {stable_mosaic.version = 11 : i64} {
  func.func @_aggregate_kernel(%arg0: i32, %arg1: i32, %arg2: memref<256x256xi8, #tpu.memory_space<vmem>>, %arg3: memref<256x128xbf16, #tpu.memory_space<vmem>>, %arg4: memref<256x128xbf16, #tpu.memory_space<vmem>>, %arg5: memref<256x1xf32, #tpu.memory_space<vmem>>, %arg6: memref<256x128xf32, #tpu.memory_space<vmem>>, %arg7: memref<256x128xf32, #tpu.memory_space<vmem>>) attributes {dimension_semantics = [#tpu.dimension_semantics<parallel>, #tpu.dimension_semantics<arbitrary>], iteration_bounds = array<i64: 1, 1>, scalar_prefetch = 0 : i64, scratch_operands = 1 : i64, tpu.core_type = #tpu.core_type<tc>, window_params = [{transform_indices = @transform_0, window_bounds = array<i64: 256, 256>}, {transform_indices = @transform_1, window_bounds = array<i64: 256, 128>}, {transform_indices = @transform_2, window_bounds = array<i64: 256, 128>}, {transform_indices = @transform_3, window_bounds = array<i64: 256, 1>}, {transform_indices = @transform_4, window_bounds = array<i64: 256, 128>}]} {
    %c0_i32 = arith.constant 0 : i32
    %0 = arith.cmpi eq, %arg1, %c0_i32 : i32
    %1 = arith.extui %0 : i1 to i32
    %c0_i32_0 = arith.constant 0 : i32
    %2 = arith.cmpi ne, %1, %c0_i32_0 : i32
    scf.if %2 {
      %cst_10 = arith.constant 0.000000e+00 : f32
      %13 = vector.broadcast %cst_10 : f32 to vector<256x128xf32>
      %c0_11 = arith.constant 0 : index
      %c0_12 = arith.constant 0 : index
      %14 = vector.load %arg7[%c0_11, %c0_12] : memref<256x128xf32, #tpu.memory_space<vmem>>, vector<256x128xf32>
      tpu.vector_store %arg7[%c0_11, %c0_12], %13 {strides = array<i32>} : memref<256x128xf32, #tpu.memory_space<vmem>>, vector<256x128xf32>,
    } else {
    }
    %c0 = arith.constant 0 : index
    %c0_1 = arith.constant 0 : index
    %3 = vector.load %arg2[%c0, %c0_1] : memref<256x256xi8, #tpu.memory_space<vmem>>, vector<256x256xi8>
    %4 = arith.sitofp %3 : vector<256x256xi8> to vector<256x256xbf16>
    %c0_2 = arith.constant 0 : index
    %c0_3 = arith.constant 0 : index
    %5 = vector.load %arg7[%c0_2, %c0_3] : memref<256x128xf32, #tpu.memory_space<vmem>>, vector<256x128xf32>
    %c0_4 = arith.constant 0 : index
    %c0_5 = arith.constant 0 : index
    %6 = vector.load %arg3[%c0_4, %c0_5] : memref<256x128xbf16, #tpu.memory_space<vmem>>, vector<256x128xbf16>
    %cst = arith.constant dense<0.000000e+00> : vector<256x128xf32>
    %7 = tpu.matmul %4, %6, %cst {dimension_numbers = #tpu.dot_dimension_numbers<[1], [0], [0], [1], [0, 0, 1, 1], [], []>} : vector<256x256xbf16>, vector<256x128xbf16>, vector<256x128xf32> -> vector<256x128xf32>
    %8 = arith.addf %5, %7 : vector<256x128xf32>
    %c0_6 = arith.constant 0 : index
    %c0_7 = arith.constant 0 : index
    %9 = vector.load %arg7[%c0_6, %c0_7] : memref<256x128xf32, #tpu.memory_space<vmem>>, vector<256x128xf32>
    tpu.vector_store %arg7[%c0_6, %c0_7], %8 {strides = array<i32>} : memref<256x128xf32, #tpu.memory_space<vmem>>, vector<256x128xf32>,
    %c0_i32_8 = arith.constant 0 : i32
    %10 = arith.cmpi eq, %arg1, %c0_i32_8 : i32
    %11 = arith.extui %10 : i1 to i32
    %c0_i32_9 = arith.constant 0 : i32
    %12 = arith.cmpi ne, %11, %c0_i32_9 : i32
    scf.if %12 {
      %c0_10 = arith.constant 0 : index
      %c0_11 = arith.constant 0 : index
      %13 = vector.load %arg7[%c0_10, %c0_11] : memref<256x128xf32, #tpu.memory_space<vmem>>, vector<256x128xf32>
      %c0_12 = arith.constant 0 : index
      %c0_13 = arith.constant 0 : index
      %14 = vector.load %arg5[%c0_12, %c0_13] : memref<256x1xf32, #tpu.memory_space<vmem>>, vector<256x1xf32>
      %15 = vector.broadcast %14 : vector<256x1xf32> to vector<256x128xf32>
      %16 = arith.mulf %13, %15 : vector<256x128xf32>
      %c0_14 = arith.constant 0 : index
      %c0_15 = arith.constant 0 : index
      %17 = vector.load %arg4[%c0_14, %c0_15] : memref<256x128xbf16, #tpu.memory_space<vmem>>, vector<256x128xbf16>
      %18 = arith.extf %17 : vector<256x128xbf16> to vector<256x128xf32>
      %19 = arith.addf %16, %18 : vector<256x128xf32>
      %c0_16 = arith.constant 0 : index
      %c0_17 = arith.constant 0 : index
      %20 = vector.load %arg6[%c0_16, %c0_17] : memref<256x128xf32, #tpu.memory_space<vmem>>, vector<256x128xf32>
      tpu.vector_store %arg6[%c0_16, %c0_17], %19 {strides = array<i32>} : memref<256x128xf32, #tpu.memory_space<vmem>>, vector<256x128xf32>,
    } else {
    }
    return
  }
  func.func @transform_0(%arg0: i32, %arg1: i32) -> (i32, i32) {
    %c0_i32 = arith.constant 0 : i32
    return %arg0, %arg1 : i32, i32
  }
  func.func @transform_1(%arg0: i32, %arg1: i32) -> (i32, i32) {
    %c0_i32 = arith.constant 0 : i32
    %c0_i32_0 = arith.constant 0 : i32
    return %arg1, %c0_i32 : i32, i32
  }
  func.func @transform_2(%arg0: i32, %arg1: i32) -> (i32, i32) {
    %c0_i32 = arith.constant 0 : i32
    %c0_i32_0 = arith.constant 0 : i32
    return %arg0, %c0_i32 : i32, i32
  }
  func.func @transform_3(%arg0: i32, %arg1: i32) -> (i32, i32) {
    %c0_i32 = arith.constant 0 : i32
    %c0_i32_0 = arith.constant 0 : i32
    return %arg0, %c0_i32 : i32, i32
  }
  func.func @transform_4(%arg0: i32, %arg1: i32) -> (i32, i32) {
    %c0_i32 = arith.constant 0 : i32
    %c0_i32_0 = arith.constant 0 : i32
    return %arg0, %c0_i32 : i32, i32
  }
}

</mosaic_0001>

<bundles_post_ra>
// kernel: graphsagex_forward.6
= control target key start
LH: loop header
LB: loop body
LE: loop exit
PB: predicated region body
PF: predicated region fallthrough
CT: control target
= control target key end

     0   :  { %v1209_v1 = vmov 0   ;;  %s1480_s1 = inlined_call_operand.vmem [shape: bf16[128,256], index: 1, kind: input, shape index: {}]   ;;  %s1481_s0 = inlined_call_operand.vmem [shape: bf16[256,128], index: 0, kind: input, shape index: {}]   ;;  %s1482_s2 = inlined_call_operand.vmem [shape: f32[1,128], index: 2, kind: input, shape index: {}]   ;;  %s1483_s3 = inlined_call_operand.vmem [shape: bf16[256,128], index: 3, kind: output, shape index: {0}]   ;;  %s1484_s4 = inlined_call_operand.vmem [shape: bf16[256,128], index: 4, kind: output, shape index: {1}]  }
   0x1   :  { %v1169_v0 = vld [vmem:[%s1480_s1 + $0x4] ss:$8 sps:$4 sm:$0xff]   ;;  %273 = vmatprep.mubr.bf16.mxu0 %v1209_v1  ;;  %353 = vmatprep.mubr.bf16.mxu1 %v1209_v1  ;;  %v1171_v2 = vld [vmem:[%s1480_s1] ss:$8 sps:$4 sm:$0xff]   ;;  %v1172_v3 = vld [vmem:[%s1480_s1 + $0x14] ss:$8 sps:$4 sm:$0xff]  }
   0x2   :  { %241 = vmatprep.subr.bf16.mxu0 %v1169_v0  ;;  %1152 = vmatprep.subr.bf16.mxu1 %v1169_v0  ;;  %v1174_v4 = vld [vmem:[%s1480_s1 + $0x10] ss:$8 sps:$4 sm:$0xff]   ;;  %v1175_v5 = vld [vmem:[%s1480_s1 + $0x24] ss:$8 sps:$4 sm:$0xff]   ;;  %v1177_v6 = vld [vmem:[%s1480_s1 + $0x20] ss:$8 sps:$4 sm:$0xff]  }
   0x3   :  { %242 = vmatpush1.bf16.msra.mxu0 %v1171_v2  ;;  %1160 = vmatpush1.bf16.msra.mxu1 %v1171_v2  ;;  %v1178_v7 = vld [vmem:[%s1480_s1 + $0x34] ss:$8 sps:$4 sm:$0xff]   ;;  %v1180_v8 = vld [vmem:[%s1480_s1 + $0x30] ss:$8 sps:$4 sm:$0xff]   ;;  %v1181_v9 = vld [vmem:[%s1480_s1 + $0x44] ss:$8 sps:$4 sm:$0xff]  }
   0x4   :  { %243 = vmatprep.subr.bf16.mxu0 %v1172_v3  ;;  %1153 = vmatprep.subr.bf16.mxu1 %v1172_v3  ;;  %v1183_v10 = vld [vmem:[%s1480_s1 + $0x40] ss:$8 sps:$4 sm:$0xff]   ;;  %v1184_v11 = vld [vmem:[%s1480_s1 + $0x54] ss:$8 sps:$4 sm:$0xff]   ;;  %v1186_v12 = vld [vmem:[%s1480_s1 + $0x50] ss:$8 sps:$4 sm:$0xff]  }
   0x5   :  { %v1187_v13 = vld [vmem:[%s1480_s1 + $0x64] ss:$8 sps:$4 sm:$0xff]   ;;  %v1189_v14 = vld [vmem:[%s1480_s1 + $0x60] ss:$8 sps:$4 sm:$0xff]   ;;  %v1190_v15 = vld [vmem:[%s1480_s1 + $0x74] ss:$8 sps:$4 sm:$0xff]  }
   0x6   :  { %v1192_v16 = vld [vmem:[%s1480_s1 + $0x70] ss:$8 sps:$4 sm:$0xff]   ;;  %v1193_v17 = vld [vmem:[%s1481_s0] sm:$0xff]   ;;  %v1195_v19 = vld [vmem:[%s1481_s0 + $0x8] sm:$0xff]  }
   0x7   :  { %244 = vmatpush1.bf16.msra.mxu0 %v1174_v4  ;;  %1161 = vmatpush1.bf16.msra.mxu1 %v1174_v4  ;;  %v1194_v18 = vld [vmem:[%s1481_s0 + $0x40] sm:$0xff]   ;;  %v1196_v20 = vld [vmem:[%s1481_s0 + $0x48] sm:$0xff]   ;;  %v1197_v21 = vld [vmem:[%s1481_s0 + $0x10] sm:$0xff]  }
   0x8   :  { %245 = vmatprep.subr.bf16.mxu0 %v1175_v5  ;;  %1154 = vmatprep.subr.bf16.mxu1 %v1175_v5  ;;  %v1198_v22 = vld [vmem:[%s1481_s0 + $0x50] sm:$0xff]   ;;  %v1199_v23 = vld [vmem:[%s1481_s0 + $0x18] sm:$0xff]   ;;  %v1201_v25 = vld [vmem:[%s1481_s0 + $0x20] sm:$0xff]  }
   0x9   :  { %v1200_v24 = vld [vmem:[%s1481_s0 + $0x58] sm:$0xff]   ;;  %v1202_v26 = vld [vmem:[%s1481_s0 + $0x60] sm:$0xff]   ;;  %v1203_v27 = vld [vmem:[%s1481_s0 + $0x28] sm:$0xff]  }
   0xa   :  { %v1204_v28 = vld [vmem:[%s1481_s0 + $0x68] sm:$0xff]   ;;  %v1205_v29 = vld [vmem:[%s1481_s0 + $0x30] sm:$0xff]   ;;  %v1207_v31 = vld [vmem:[%s1481_s0 + $0x38] sm:$0xff]  }
   0xb   :  { %246 = vmatpush1.bf16.msra.mxu0 %v1177_v6  ;;  %1162 = vmatpush1.bf16.msra.mxu1 %v1177_v6  ;;  %v1206_v30 = vld [vmem:[%s1481_s0 + $0x70] sm:$0xff]   ;;  %v1208_v32 = vld [vmem:[%s1481_s0 + $0x78] sm:$0xff]   ;;  %v1350_v36 = vld [vmem:[%s1482_s2] ss:$0 sm:$0xff] }
   0xc   :  { %247 = vmatprep.subr.bf16.mxu0 %v1178_v7  ;;  %1155 = vmatprep.subr.bf16.mxu1 %v1178_v7 }
   0xf   :  { %248 = vmatpush1.bf16.msra.mxu0 %v1180_v8  ;;  %1163 = vmatpush1.bf16.msra.mxu1 %v1180_v8 }
  0x10   :  { %249 = vmatprep.subr.bf16.mxu0 %v1181_v9  ;;  %1156 = vmatprep.subr.bf16.mxu1 %v1181_v9 }
  0x13   :  { %250 = vmatpush1.bf16.msra.mxu0 %v1183_v10  ;;  %1164 = vmatpush1.bf16.msra.mxu1 %v1183_v10 }
  0x14   :  { %251 = vmatprep.subr.bf16.mxu0 %v1184_v11  ;;  %1157 = vmatprep.subr.bf16.mxu1 %v1184_v11 }
  0x17   :  { %252 = vmatpush1.bf16.msra.mxu0 %v1186_v12  ;;  %1165 = vmatpush1.bf16.msra.mxu1 %v1186_v12 }
  0x18   :  { %253 = vmatprep.subr.bf16.mxu0 %v1187_v13  ;;  %1158 = vmatprep.subr.bf16.mxu1 %v1187_v13 }
  0x1b   :  { %254 = vmatpush1.bf16.msra.mxu0 %v1189_v14  ;;  %1166 = vmatpush1.bf16.msra.mxu1 %v1189_v14 }
  0x1c   :  { %255 = vmatprep.subr.bf16.mxu0 %v1190_v15  ;;  %1159 = vmatprep.subr.bf16.mxu1 %v1190_v15 }
  0x1f   :  { %256 = vmatpush1.bf16.msra.mxu0 %v1192_v16  ;;  %1167 = vmatpush1.bf16.msra.mxu1 %v1192_v16 }
  0x22   :  { %274 = vmatmul.mubr.bf16.vlgmr.msra.gmra.mrb[0].mxu0 %v1193_v17  ;;  %354 = vmatmul.mubr.bf16.vlgmr.msra.gmra.mrb[0].mxu1 %v1194_v18 }
  0x23   :  { %283 = vmatprep.mubr.bf16.mxu0 %v1209_v1  ;;  %363 = vmatprep.mubr.bf16.mxu1 %v1209_v1 }
  0x2a   :  { %284 = vmatmul.mubr.bf16.gmra.mrb[4].mxu0 %v1195_v19  ;;  %364 = vmatmul.mubr.bf16.gmra.mrb[4].mxu1 %v1196_v20 }
  0x2b   :  { %293 = vmatprep.mubr.bf16.mxu0 %v1209_v1  ;;  %373 = vmatprep.mubr.bf16.mxu1 %v1209_v1 }
  0x32   :  { %294 = vmatmul.mubr.bf16.gmra.mrb[8].mxu0 %v1197_v21  ;;  %374 = vmatmul.mubr.bf16.gmra.mrb[8].mxu1 %v1198_v22 }
  0x33   :  { %303 = vmatprep.mubr.bf16.mxu0 %v1209_v1  ;;  %383 = vmatprep.mubr.bf16.mxu1 %v1209_v1 }
  0x3a   :  { %304 = vmatmul.mubr.bf16.gmra.mrb[12].mxu0 %v1199_v23  ;;  %384 = vmatmul.mubr.bf16.gmra.mrb[12].mxu1 %v1200_v24 }
  0x3b   :  { %313 = vmatprep.mubr.bf16.mxu0 %v1209_v1  ;;  %393 = vmatprep.mubr.bf16.mxu1 %v1209_v1 }
  0x42   :  { %314 = vmatmul.mubr.bf16.gmra.mrb[16].mxu0 %v1201_v25  ;;  %394 = vmatmul.mubr.bf16.gmra.mrb[16].mxu1 %v1202_v26 }
  0x43   :  { %323 = vmatprep.mubr.bf16.mxu0 %v1209_v1  ;;  %403 = vmatprep.mubr.bf16.mxu1 %v1209_v1 }
  0x4a   :  { %324 = vmatmul.mubr.bf16.gmra.mrb[20].mxu0 %v1203_v27  ;;  %404 = vmatmul.mubr.bf16.gmra.mrb[20].mxu1 %v1204_v28 }
  0x4b   :  { %333 = vmatprep.mubr.bf16.mxu0 %v1209_v1  ;;  %413 = vmatprep.mubr.bf16.mxu1 %v1209_v1 }
  0x52   :  { %334 = vmatmul.mubr.bf16.gmra.mrb[24].mxu0 %v1205_v29  ;;  %414 = vmatmul.mubr.bf16.gmra.mrb[24].mxu1 %v1206_v30 }
  0x53   :  { %343 = vmatprep.mubr.bf16.mxu0 %v1209_v1  ;;  %423 = vmatprep.mubr.bf16.mxu1 %v1209_v1 }
  0x5a   :  { %344 = vmatmul.mubr.bf16.gmra.mrb[28].mxu0 %v1207_v31  ;;  %424 = vmatmul.mubr.bf16.gmra.mrb[28].mxu1 %v1208_v32 }
  0xf5   :  { %v275_v33 = vpop.f32.mrb[0].mxu0  ;;  %v355_v34 = vpop.f32.mrb[0].mxu1 }
  0xf6   :  { %v277_v35 = vpop.f32.mrb[1].mxu0  ;;  %v357_v37 = vpop.f32.mrb[1].mxu1 }
  0xf7   :  { %v279_v38 = vpop.f32.mrb[2].mxu0  ;;  %v359_v39 = vpop.f32.mrb[2].mxu1  ;;  %v601_v44 = vadd.f32 %v1350_v36, %v277_v35  ;;  %v617_v45 = vadd.f32 %v1350_v36, %v357_v37 }
  0xf8   :  { %v965_v40 = vpack.c.bf16 %v279_v38, %v275_v33  ;;  %v1005_v41 = vpack.c.bf16 %v359_v39, %v355_v34  ;;  %v281_v42 = vpop.f32.mrb[3].mxu0  ;;  %v361_v43 = vpop.f32.mrb[3].mxu1 }
  0xf9   :  { %v602_v46 = vadd.f32 %v1350_v36, %v281_v42  ;;  %v618_v47 = vadd.f32 %v1350_v36, %v361_v43 }
  0xfa   :  { %966 = vst [vmem:[%s1483_s3] sm:$0xff] %v965_v40   ;;  %1129 = vst [vmem:[%s1483_s3 + $0x40] sm:$0xff] %v1005_v41  }
  0xfb   :  { %v1045_v48 = vpack.c.bf16 %v602_v46, %v601_v44  ;;  %v1085_v49 = vpack.c.bf16 %v618_v47, %v617_v45 }
  0xfd   :  { %1046 = vst [vmem:[%s1484_s4] sm:$0xff] %v1045_v48   ;;  %1144 = vst [vmem:[%s1484_s4 + $0x40] sm:$0xff] %v1085_v49   ;;  %v285_v50 = vpop.f32.mrb[4].mxu0  ;;  %v365_v51 = vpop.f32.mrb[4].mxu1 }
  0xfe   :  { %v287_v52 = vpop.f32.mrb[5].mxu0  ;;  %v367_v53 = vpop.f32.mrb[5].mxu1 }
  0xff   :  { %v289_v54 = vpop.f32.mrb[6].mxu0  ;;  %v369_v55 = vpop.f32.mrb[6].mxu1  ;;  %v603_v60 = vadd.f32 %v1350_v36, %v287_v52  ;;  %v619_v61 = vadd.f32 %v1350_v36, %v367_v53 }
 0x100   :  { %v970_v56 = vpack.c.bf16 %v289_v54, %v285_v50  ;;  %v1010_v57 = vpack.c.bf16 %v369_v55, %v365_v51  ;;  %v291_v58 = vpop.f32.mrb[7].mxu0  ;;  %v371_v59 = vpop.f32.mrb[7].mxu1 }
 0x101   :  { %v604_v62 = vadd.f32 %v1350_v36, %v291_v58  ;;  %v620_v63 = vadd.f32 %v1350_v36, %v371_v59 }
 0x102   :  { %1122 = vst [vmem:[%s1483_s3 + $0x8] sm:$0xff] %v970_v56   ;;  %1130 = vst [vmem:[%s1483_s3 + $0x48] sm:$0xff] %v1010_v57  }
 0x103   :  { %v1050_v0 = vpack.c.bf16 %v604_v62, %v603_v60  ;;  %v1090_v1 = vpack.c.bf16 %v620_v63, %v619_v61 }
 0x105   :  { %1137 = vst [vmem:[%s1484_s4 + $0x8] sm:$0xff] %v1050_v0   ;;  %1145 = vst [vmem:[%s1484_s4 + $0x48] sm:$0xff] %v1090_v1   ;;  %v295_v2 = vpop.f32.mrb[8].mxu0  ;;  %v375_v3 = vpop.f32.mrb[8].mxu1 }
 0x106   :  { %v297_v4 = vpop.f32.mrb[9].mxu0  ;;  %v377_v5 = vpop.f32.mrb[9].mxu1 }
 0x107   :  { %v299_v6 = vpop.f32.mrb[10].mxu0  ;;  %v379_v7 = vpop.f32.mrb[10].mxu1  ;;  %v605_v12 = vadd.f32 %v1350_v36, %v297_v4  ;;  %v621_v13 = vadd.f32 %v1350_v36, %v377_v5 }
 0x108   :  { %v975_v8 = vpack.c.bf16 %v299_v6, %v295_v2  ;;  %v1015_v9 = vpack.c.bf16 %v379_v7, %v375_v3  ;;  %v301_v10 = vpop.f32.mrb[11].mxu0  ;;  %v381_v11 = vpop.f32.mrb[11].mxu1 }
 0x109   :  { %v606_v14 = vadd.f32 %v1350_v36, %v301_v10  ;;  %v622_v15 = vadd.f32 %v1350_v36, %v381_v11 }
 0x10a   :  { %1123 = vst [vmem:[%s1483_s3 + $0x10] sm:$0xff] %v975_v8   ;;  %1131 = vst [vmem:[%s1483_s3 + $0x50] sm:$0xff] %v1015_v9  }
 0x10b   :  { %v1055_v16 = vpack.c.bf16 %v606_v14, %v605_v12  ;;  %v1095_v17 = vpack.c.bf16 %v622_v15, %v621_v13 }
 0x10d   :  { %1138 = vst [vmem:[%s1484_s4 + $0x10] sm:$0xff] %v1055_v16   ;;  %1146 = vst [vmem:[%s1484_s4 + $0x50] sm:$0xff] %v1095_v17   ;;  %v305_v18 = vpop.f32.mrb[12].mxu0  ;;  %v385_v19 = vpop.f32.mrb[12].mxu1 }
 0x10e   :  { %v307_v20 = vpop.f32.mrb[13].mxu0  ;;  %v387_v21 = vpop.f32.mrb[13].mxu1 }
 0x10f   :  { %v309_v22 = vpop.f32.mrb[14].mxu0  ;;  %v389_v23 = vpop.f32.mrb[14].mxu1  ;;  %v607_v28 = vadd.f32 %v1350_v36, %v307_v20  ;;  %v623_v29 = vadd.f32 %v1350_v36, %v387_v21 }
 0x110   :  { %v980_v24 = vpack.c.bf16 %v309_v22, %v305_v18  ;;  %v1020_v25 = vpack.c.bf16 %v389_v23, %v385_v19  ;;  %v311_v26 = vpop.f32.mrb[15].mxu0  ;;  %v391_v27 = vpop.f32.mrb[15].mxu1 }
 0x111   :  { %v608_v30 = vadd.f32 %v1350_v36, %v311_v26  ;;  %v624_v31 = vadd.f32 %v1350_v36, %v391_v27 }
 0x112   :  { %1124 = vst [vmem:[%s1483_s3 + $0x18] sm:$0xff] %v980_v24   ;;  %1132 = vst [vmem:[%s1483_s3 + $0x58] sm:$0xff] %v1020_v25  }
 0x113   :  { %v1060_v32 = vpack.c.bf16 %v608_v30, %v607_v28  ;;  %v1100_v33 = vpack.c.bf16 %v624_v31, %v623_v29 }
 0x115   :  { %1139 = vst [vmem:[%s1484_s4 + $0x18] sm:$0xff] %v1060_v32   ;;  %1147 = vst [vmem:[%s1484_s4 + $0x58] sm:$0xff] %v1100_v33   ;;  %v315_v34 = vpop.f32.mrb[16].mxu0  ;;  %v395_v35 = vpop.f32.mrb[16].mxu1 }
 0x116   :  { %v317_v37 = vpop.f32.mrb[17].mxu0  ;;  %v397_v38 = vpop.f32.mrb[17].mxu1 }
 0x117   :  { %v319_v39 = vpop.f32.mrb[18].mxu0  ;;  %v399_v40 = vpop.f32.mrb[18].mxu1  ;;  %v609_v45 = vadd.f32 %v1350_v36, %v317_v37  ;;  %v625_v46 = vadd.f32 %v1350_v36, %v397_v38 }
 0x118   :  { %v985_v41 = vpack.c.bf16 %v319_v39, %v315_v34  ;;  %v1025_v42 = vpack.c.bf16 %v399_v40, %v395_v35  ;;  %v321_v43 = vpop.f32.mrb[19].mxu0  ;;  %v401_v44 = vpop.f32.mrb[19].mxu1 }
 0x119   :  { %v610_v47 = vadd.f32 %v1350_v36, %v321_v43  ;;  %v626_v48 = vadd.f32 %v1350_v36, %v401_v44 }
 0x11a   :  { %1125 = vst [vmem:[%s1483_s3 + $0x20] sm:$0xff] %v985_v41   ;;  %1133 = vst [vmem:[%s1483_s3 + $0x60] sm:$0xff] %v1025_v42  }
 0x11b   :  { %v1065_v49 = vpack.c.bf16 %v610_v47, %v609_v45  ;;  %v1105_v50 = vpack.c.bf16 %v626_v48, %v625_v46 }
 0x11d   :  { %1140 = vst [vmem:[%s1484_s4 + $0x20] sm:$0xff] %v1065_v49   ;;  %1148 = vst [vmem:[%s1484_s4 + $0x60] sm:$0xff] %v1105_v50   ;;  %v325_v51 = vpop.f32.mrb[20].mxu0  ;;  %v405_v52 = vpop.f32.mrb[20].mxu1 }
 0x11e   :  { %v327_v53 = vpop.f32.mrb[21].mxu0  ;;  %v407_v54 = vpop.f32.mrb[21].mxu1 }
 0x11f   :  { %v329_v55 = vpop.f32.mrb[22].mxu0  ;;  %v409_v56 = vpop.f32.mrb[22].mxu1  ;;  %v611_v61 = vadd.f32 %v1350_v36, %v327_v53  ;;  %v627_v62 = vadd.f32 %v1350_v36, %v407_v54 }
 0x120   :  { %v990_v57 = vpack.c.bf16 %v329_v55, %v325_v51  ;;  %v1030_v58 = vpack.c.bf16 %v409_v56, %v405_v52  ;;  %v331_v59 = vpop.f32.mrb[23].mxu0  ;;  %v411_v60 = vpop.f32.mrb[23].mxu1 }
 0x121   :  { %v612_v63 = vadd.f32 %v1350_v36, %v331_v59  ;;  %v628_v0 = vadd.f32 %v1350_v36, %v411_v60 }
 0x122   :  { %1126 = vst [vmem:[%s1483_s3 + $0x28] sm:$0xff] %v990_v57   ;;  %1134 = vst [vmem:[%s1483_s3 + $0x68] sm:$0xff] %v1030_v58  }
 0x123   :  { %v1070_v1 = vpack.c.bf16 %v612_v63, %v611_v61  ;;  %v1110_v2 = vpack.c.bf16 %v628_v0, %v627_v62 }
 0x125   :  { %1141 = vst [vmem:[%s1484_s4 + $0x28] sm:$0xff] %v1070_v1   ;;  %1149 = vst [vmem:[%s1484_s4 + $0x68] sm:$0xff] %v1110_v2   ;;  %v335_v3 = vpop.f32.mrb[24].mxu0  ;;  %v415_v4 = vpop.f32.mrb[24].mxu1 }
 0x126   :  { %v337_v5 = vpop.f32.mrb[25].mxu0  ;;  %v417_v6 = vpop.f32.mrb[25].mxu1 }
 0x127   :  { %v339_v7 = vpop.f32.mrb[26].mxu0  ;;  %v419_v8 = vpop.f32.mrb[26].mxu1  ;;  %v613_v13 = vadd.f32 %v1350_v36, %v337_v5  ;;  %v629_v14 = vadd.f32 %v1350_v36, %v417_v6 }
 0x128   :  { %v995_v9 = vpack.c.bf16 %v339_v7, %v335_v3  ;;  %v1035_v10 = vpack.c.bf16 %v419_v8, %v415_v4  ;;  %v341_v11 = vpop.f32.mrb[27].mxu0  ;;  %v421_v12 = vpop.f32.mrb[27].mxu1 }
 0x129   :  { %v614_v15 = vadd.f32 %v1350_v36, %v341_v11  ;;  %v630_v16 = vadd.f32 %v1350_v36, %v421_v12 }
 0x12a   :  { %1127 = vst [vmem:[%s1483_s3 + $0x30] sm:$0xff] %v995_v9   ;;  %1135 = vst [vmem:[%s1483_s3 + $0x70] sm:$0xff] %v1035_v10  }
 0x12b   :  { %v1075_v17 = vpack.c.bf16 %v614_v15, %v613_v13  ;;  %v1115_v18 = vpack.c.bf16 %v630_v16, %v629_v14 }
 0x12d   :  { %1142 = vst [vmem:[%s1484_s4 + $0x30] sm:$0xff] %v1075_v17   ;;  %1150 = vst [vmem:[%s1484_s4 + $0x70] sm:$0xff] %v1115_v18   ;;  %v345_v19 = vpop.f32.mrb[28].mxu0  ;;  %v425_v20 = vpop.f32.mrb[28].mxu1 }
 0x12e   :  { %v347_v21 = vpop.f32.mrb[29].mxu0  ;;  %v427_v22 = vpop.f32.mrb[29].mxu1 }
 0x12f   :  { %v349_v23 = vpop.f32.mrb[30].mxu0  ;;  %v429_v24 = vpop.f32.mrb[30].mxu1  ;;  %v615_v29 = vadd.f32 %v1350_v36, %v347_v21  ;;  %v631_v30 = vadd.f32 %v1350_v36, %v427_v22 }
 0x130   :  { %v1000_v25 = vpack.c.bf16 %v349_v23, %v345_v19  ;;  %v1040_v26 = vpack.c.bf16 %v429_v24, %v425_v20  ;;  %v351_v27 = vpop.f32.mrb[31].mxu0  ;;  %v431_v28 = vpop.f32.mrb[31].mxu1 }
 0x131   :  { %v616_v31 = vadd.f32 %v1350_v36, %v351_v27  ;;  %v632_v32 = vadd.f32 %v1350_v36, %v431_v28 }
 0x132   :  { %1128 = vst [vmem:[%s1483_s3 + $0x38] sm:$0xff] %v1000_v25   ;;  %1136 = vst [vmem:[%s1483_s3 + $0x78] sm:$0xff] %v1040_v26  }
 0x133   :  { %v1080_v33 = vpack.c.bf16 %v616_v31, %v615_v29  ;;  %v1120_v34 = vpack.c.bf16 %v632_v32, %v631_v30 }
 0x135   :  { %1143 = vst [vmem:[%s1484_s4 + $0x38] sm:$0xff] %v1080_v33   ;;  %1151 = vst [vmem:[%s1484_s4 + $0x78] sm:$0xff] %v1120_v34  }

// kernel: graphsagex_forward.11
= control target key start
LH: loop header
LB: loop body
LE: loop exit
PB: predicated region body
PF: predicated region fallthrough
CT: control target
= control target key end

     0   :  { %v1120_v1 = vmov 0   ;;  %s1524_s1 = inlined_call_operand.vmem [shape: bf16[256,128], index: 1, kind: input, shape index: {}]   ;;  %s1525_s0 = inlined_call_operand.vmem [shape: s8[256,256], index: 0, kind: input, shape index: {}]   ;;  %s1526_s3 = inlined_call_operand.vmem [shape: f32[256,1], index: 3, kind: input, shape index: {}]   ;;  %s1527_s2 = inlined_call_operand.vmem [shape: bf16[256,128], index: 2, kind: input, shape index: {}]   ;;  %s1528_s4 = inlined_call_operand.vmem [shape: f32[256,128], index: 4, kind: output, shape index: {}]  }
   0x1   :  { %v1104_v0 = vld [vmem:[%s1524_s1 + $0x40] sm:$0xff]   ;;  %1103 = vset.pattern.permute.xlu1 %v1120_v1  ;;  %1102 = vset.pattern.permute.xlu0 %v1120_v1  ;;  %v1106_v3 = vld [vmem:[%s1524_s1 + $0x48] sm:$0xff]   ;;  %v1108_v5 = vld [vmem:[%s1524_s1 + $0x50] sm:$0xff]  }
   0x2   :  { %v1105_v2 = vld [vmem:[%s1524_s1] sm:$0xff]   ;;  %973 = vmatprep.subr.bf16.mxu0 %v1104_v0  ;;  %1085 = vmatprep.subr.bf16.mxu1 %v1104_v0  ;;  %v1107_v4 = vld [vmem:[%s1524_s1 + $0x8] sm:$0xff]   ;;  %v1109_v6 = vld [vmem:[%s1524_s1 + $0x10] sm:$0xff]  }
   0x3   :  { %974 = vmatpush3.bf16.msra.mxu0 %v1105_v2  ;;  %1093 = vmatpush3.bf16.msra.mxu1 %v1105_v2  ;;  %v1110_v7 = vld [vmem:[%s1524_s1 + $0x58] sm:$0xff]   ;;  %v1112_v9 = vld [vmem:[%s1524_s1 + $0x60] sm:$0xff]   ;;  %v1114_v11 = vld [vmem:[%s1524_s1 + $0x68] sm:$0xff]  }
   0x4   :  { %975 = vmatprep.subr.bf16.mxu0 %v1106_v3  ;;  %1086 = vmatprep.subr.bf16.mxu1 %v1106_v3  ;;  %v1111_v8 = vld [vmem:[%s1524_s1 + $0x18] sm:$0xff]   ;;  %v1113_v10 = vld [vmem:[%s1524_s1 + $0x20] sm:$0xff]   ;;  %v55_v12 = vld [vmem:[%s1525_s0 + $0x8] sm:$0xff] }
   0x5   :  { %v63_v13 = vld [vmem:[%s1525_s0 + $0x48] sm:$0xff]  ;;  %v71_v14 = vunpack.c.l.s8.bf16 %v55_v12  ;;  %v524_v17 = vld [vmem:[%s1526_s3 + $0x10] sm:$0xff]  ;;  %v522_v18 = vld [vmem:[%s1526_s3] sm:$0xff]  ;;  %v73_v31 = vunpack.c.h.s8.bf16 %v55_v12 }
   0x6   :  { %v87_v15 = vunpack.c.l.s8.bf16 %v63_v13  ;;  %v1115_v16 = vld [vmem:[%s1524_s1 + $0x28] sm:$0xff]   ;;  %v1116_v19 = vld [vmem:[%s1524_s1 + $0x70] sm:$0xff]   ;;  %566 = vperm.xlu1 %1103, %v524_v17   ;;  %556 = vperm.xlu0 %1102, %v522_v18   ;;  %v525_v21 = vld [vmem:[%s1526_s3 + $0x18] sm:$0xff]  ;;  %v89_v32 = vunpack.c.h.s8.bf16 %v63_v13 }
   0x7   :  { %976 = vmatpush3.bf16.msra.mxu0 %v1107_v4  ;;  %1094 = vmatpush3.bf16.msra.mxu1 %v1107_v4  ;;  %v1117_v20 = vld [vmem:[%s1524_s1 + $0x30] sm:$0xff]   ;;  %v523_v22 = vld [vmem:[%s1526_s3 + $0x8] sm:$0xff]  ;;  %v1118_v23 = vld [vmem:[%s1524_s1 + $0x78] sm:$0xff]  }
   0x8   :  { %977 = vmatprep.subr.bf16.mxu0 %v1108_v5  ;;  %1087 = vmatprep.subr.bf16.mxu1 %v1108_v5  ;;  %v1119_v24 = vld [vmem:[%s1524_s1 + $0x38] sm:$0xff]   ;;  %v54_v25 = vld [vmem:[%s1525_s0] sm:$0xff]  ;;  %v527_v27 = vld [vmem:[%s1526_s3 + $0x28] sm:$0xff] }
   0x9   :  { %294 = vmatprep.mubr.bf16.mxu0 %v71_v14  ;;  %358 = vmatprep.mubr.bf16.mxu1 %v87_v15  ;;  %v62_v26 = vld [vmem:[%s1525_s0 + $0x40] sm:$0xff]  ;;  %v70_v29 = vunpack.c.l.s8.bf16 %v54_v25  ;;  %v529_v33 = vld [vmem:[%s1526_s3 + $0x38] sm:$0xff]  ;;  %v528_v34 = vld [vmem:[%s1526_s3 + $0x30] sm:$0xff]  ;;  %v72_v39 = vunpack.c.h.s8.bf16 %v54_v25 }
   0xa   :  { %571 = vperm.xlu1 %1103, %v525_v21   ;;  %561 = vperm.xlu0 %1102, %v523_v22   ;;  %v526_v28 = vld [vmem:[%s1526_s3 + $0x20] sm:$0xff]  ;;  %v86_v30 = vunpack.c.l.s8.bf16 %v62_v26  ;;  %v57_v35 = vld [vmem:[%s1525_s0 + $0x18] sm:$0xff]  ;;  %v531_v37 = vld [vmem:[%s1526_s3 + $0x48] sm:$0xff]  ;;  %v88_v40 = vunpack.c.h.s8.bf16 %v62_v26 }
   0xb   :  { %978 = vmatpush3.bf16.msra.mxu0 %v1109_v6  ;;  %1095 = vmatpush3.bf16.msra.mxu1 %v1109_v6  ;;  %v65_v36 = vld [vmem:[%s1525_s0 + $0x58] sm:$0xff]  ;;  %v530_v38 = vld [vmem:[%s1526_s3 + $0x40] sm:$0xff]  ;;  %v75_v41 = vunpack.c.l.s8.bf16 %v57_v35  ;;  %v532_v44 = vld [vmem:[%s1526_s3 + $0x50] sm:$0xff]  ;;  %v77_v51 = vunpack.c.h.s8.bf16 %v57_v35 }
   0xc   :  { %979 = vmatprep.subr.bf16.mxu0 %v1110_v7  ;;  %1088 = vmatprep.subr.bf16.mxu1 %v1110_v7  ;;  %v91_v42 = vunpack.c.l.s8.bf16 %v65_v36  ;;  %v533_v43 = vld [vmem:[%s1526_s3 + $0x58] sm:$0xff]  ;;  %v56_v45 = vld [vmem:[%s1525_s0 + $0x10] sm:$0xff]  ;;  %v535_v47 = vld [vmem:[%s1526_s3 + $0x68] sm:$0xff]  ;;  %v93_v52 = vunpack.c.h.s8.bf16 %v65_v36 }
   0xd   :  { %v64_v46 = vld [vmem:[%s1525_s0 + $0x50] sm:$0xff]  ;;  %v534_v48 = vld [vmem:[%s1526_s3 + $0x60] sm:$0xff]  ;;  %v74_v49 = vunpack.c.l.s8.bf16 %v56_v45  ;;  %v537_v53 = vld [vmem:[%s1526_s3 + $0x78] sm:$0xff]  ;;  %v76_v59 = vunpack.c.h.s8.bf16 %v56_v45 }
   0xe   :  { %581 = vperm.xlu1 %1103, %v527_v27   ;;  %576 = vperm.xlu0 %1102, %v526_v28   ;;  %v90_v50 = vunpack.c.l.s8.bf16 %v64_v46  ;;  %v536_v54 = vld [vmem:[%s1526_s3 + $0x70] sm:$0xff]  ;;  %v59_v55 = vld [vmem:[%s1525_s0 + $0x28] sm:$0xff]  ;;  %v538_v58 = vld [vmem:[%s1526_s3 + $0x80] sm:$0xff]  ;;  %v92_v60 = vunpack.c.h.s8.bf16 %v64_v46 }
   0xf   :  { %980 = vmatpush3.bf16.msra.mxu0 %v1111_v8  ;;  %1096 = vmatpush3.bf16.msra.mxu1 %v1111_v8  ;;  %v67_v56 = vld [vmem:[%s1525_s0 + $0x68] sm:$0xff]  ;;  %v79_v61 = vunpack.c.l.s8.bf16 %v59_v55  ;;  %v541_v63 = vld [vmem:[%s1526_s3 + $0x98] sm:$0xff]  ;;  %v540_v0 = vld [vmem:[%s1526_s3 + $0x90] sm:$0xff]  ;;  %v81_v7 = vunpack.c.h.s8.bf16 %v59_v55 }
  0x10   :  { %981 = vmatprep.subr.bf16.mxu0 %v1112_v9  ;;  %1089 = vmatprep.subr.bf16.mxu1 %v1112_v9  ;;  %v539_v57 = vld [vmem:[%s1526_s3 + $0x88] sm:$0xff]  ;;  %v95_v62 = vunpack.c.l.s8.bf16 %v67_v56  ;;  %v58_v1 = vld [vmem:[%s1525_s0 + $0x20] sm:$0xff]  ;;  %v97_v8 = vunpack.c.h.s8.bf16 %v67_v56  ;;  %v545_v9 = vld [vmem:[%s1526_s3 + $0xb8] sm:$0xff] }
  0x11   :  { %v66_v2 = vld [vmem:[%s1525_s0 + $0x60] sm:$0xff]  ;;  %v543_v3 = vld [vmem:[%s1526_s3 + $0xa8] sm:$0xff]  ;;  %v78_v5 = vunpack.c.l.s8.bf16 %v58_v1  ;;  %v69_v12 = vld [vmem:[%s1525_s0 + $0x78] sm:$0xff]  ;;  %v80_v15 = vunpack.c.h.s8.bf16 %v58_v1 }
  0x12   :  { %591 = vperm.xlu1 %1103, %v529_v33   ;;  %586 = vperm.xlu0 %1102, %v528_v34   ;;  %v542_v4 = vld [vmem:[%s1526_s3 + $0xa0] sm:$0xff]  ;;  %v94_v6 = vunpack.c.l.s8.bf16 %v66_v2  ;;  %v547_v13 = vld [vmem:[%s1526_s3 + $0xc8] sm:$0xff]  ;;  %v99_v18 = vunpack.c.l.s8.bf16 %v69_v12  ;;  %v60_v21 = vld [vmem:[%s1525_s0 + $0x30] sm:$0xff]  ;;  %v101_v28 = vunpack.c.h.s8.bf16 %v69_v12 }
  0x13   :  { %982 = vmatpush3.bf16.msra.mxu0 %v1113_v10  ;;  %1097 = vmatpush3.bf16.msra.mxu1 %v1113_v10  ;;  %v544_v10 = vld [vmem:[%s1526_s3 + $0xb0] sm:$0xff]  ;;  %v546_v14 = vld [vmem:[%s1526_s3 + $0xc0] sm:$0xff]  ;;  %v82_v25 = vunpack.c.l.s8.bf16 %v60_v21  ;;  %v958_v12 = vld [vmem:[%s1527_s2 + $0x8] sm:$0xff]  }
  0x14   :  { %983 = vmatprep.subr.bf16.mxu0 %v1114_v11  ;;  %1090 = vmatprep.subr.bf16.mxu1 %v1114_v11  ;;  %v61_v11 = vld [vmem:[%s1525_s0 + $0x38] sm:$0xff]  ;;  %v68_v22 = vld [vmem:[%s1525_s0 + $0x70] sm:$0xff] }
  0x15   :  { %v83_v17 = vunpack.c.l.s8.bf16 %v61_v11  ;;  %v98_v26 = vunpack.c.l.s8.bf16 %v68_v22  ;;  %v85_v27 = vunpack.c.h.s8.bf16 %v61_v11 }
  0x16   :  { %601 = vperm.xlu1 %1103, %v531_v37   ;;  %596 = vperm.xlu0 %1102, %v530_v38  }
  0x17   :  { %984 = vmatpush3.bf16.msra.mxu0 %v1115_v16  ;;  %1098 = vmatpush3.bf16.msra.mxu1 %v1115_v16  ;;  %v96_v16 = vunpack.c.h.s8.bf16 %v66_v2 }
  0x18   :  { %985 = vmatprep.subr.bf16.mxu0 %v1116_v19  ;;  %1091 = vmatprep.subr.bf16.mxu1 %v1116_v19  ;;  %v549_v19 = vld [vmem:[%s1526_s3 + $0xd8] sm:$0xff] }
  0x1a   :  { %611 = vperm.xlu1 %1103, %v533_v43   ;;  %606 = vperm.xlu0 %1102, %v532_v44  }
  0x1b   :  { %986 = vmatpush3.bf16.msra.mxu0 %v1117_v20  ;;  %1099 = vmatpush3.bf16.msra.mxu1 %v1117_v20  ;;  %v548_v20 = vld [vmem:[%s1526_s3 + $0xd0] sm:$0xff] }
  0x1c   :  { %987 = vmatprep.subr.bf16.mxu0 %v1118_v23  ;;  %1092 = vmatprep.subr.bf16.mxu1 %v1118_v23  ;;  %v551_v23 = vld [vmem:[%s1526_s3 + $0xe8] sm:$0xff] }
  0x1e   :  { %621 = vperm.xlu1 %1103, %v535_v47   ;;  %616 = vperm.xlu0 %1102, %v534_v48  }
  0x1f   :  { %988 = vmatpush3.bf16.msra.mxu0 %v1119_v24  ;;  %1100 = vmatpush3.bf16.msra.mxu1 %v1119_v24  ;;  %v550_v24 = vld [vmem:[%s1526_s3 + $0xe0] sm:$0xff] }
  0x22   :  { %295 = vmatmul.mubr.bf16.vlgmr.msra.gmra.mrb[0].mxu0 %v70_v29  ;;  %359 = vmatmul.mubr.bf16.vlgmr.msra.gmra.mrb[0].mxu1 %v86_v30  ;;  %v553_v29 = vld [vmem:[%s1526_s3 + $0xf8] sm:$0xff]  ;;  %v552_v30 = vld [vmem:[%s1526_s3 + $0xf0] sm:$0xff] }
  0x23   :  { %302 = vmatprep.mubr.bf16.mxu0 %v73_v31  ;;  %366 = vmatprep.mubr.bf16.mxu1 %v89_v32  ;;  %v84_v31 = vunpack.c.h.s8.bf16 %v60_v21  ;;  %v100_v32 = vunpack.c.h.s8.bf16 %v68_v22  ;;  %v900_v21 = vunpack.c.l.bf16 %v958_v12 }
  0x24   :  { %631 = vperm.xlu1 %1103, %v537_v53   ;;  %626 = vperm.xlu0 %1102, %v536_v54  }
  0x28   :  { %641 = vperm.xlu1 %1103, %v539_v57   ;;  %636 = vperm.xlu0 %1102, %v538_v58  }
  0x2a   :  { %303 = vmatmul.mubr.bf16.gmra.mrb[4].mxu0 %v72_v39  ;;  %367 = vmatmul.mubr.bf16.gmra.mrb[4].mxu1 %v88_v40 }
  0x2b   :  { %310 = vmatprep.mubr.bf16.mxu0 %v75_v41  ;;  %374 = vmatprep.mubr.bf16.mxu1 %v91_v42 }
  0x2c   :  { %651 = vperm.xlu1 %1103, %v541_v63   ;;  %646 = vperm.xlu0 %1102, %v540_v0  }
  0x30   :  { %661 = vperm.xlu1 %1103, %v543_v3   ;;  %656 = vperm.xlu0 %1102, %v542_v4  }
  0x32   :  { %311 = vmatmul.mubr.bf16.gmra.mrb[8].mxu0 %v74_v49  ;;  %375 = vmatmul.mubr.bf16.gmra.mrb[8].mxu1 %v90_v50  ;;  %v895_v50 = vld [vmem:[%s1527_s2] sm:$0xff]  }
  0x33   :  { %318 = vmatprep.mubr.bf16.mxu0 %v77_v51  ;;  %382 = vmatprep.mubr.bf16.mxu1 %v93_v52  ;;  %v965_v51 = vld [vmem:[%s1527_s2 + $0x40] sm:$0xff]   ;;  %v896_v57 = vunpack.c.l.bf16 %v895_v50  ;;  %v897_v63 = vunpack.c.h.bf16 %v895_v50 }
  0x34   :  { %671 = vperm.xlu1 %1103, %v545_v9   ;;  %666 = vperm.xlu0 %1102, %v544_v10   ;;  %v929_v1 = vunpack.c.h.bf16 %v965_v51 }
  0x38   :  { %681 = vperm.xlu1 %1103, %v547_v13   ;;  %676 = vperm.xlu0 %1102, %v546_v14   ;;  %v966_v13 = vld [vmem:[%s1527_s2 + $0x48] sm:$0xff]  }
  0x3a   :  { %319 = vmatmul.mubr.bf16.gmra.mrb[12].mxu0 %v76_v59  ;;  %383 = vmatmul.mubr.bf16.gmra.mrb[12].mxu1 %v92_v60  ;;  %v928_v59 = vunpack.c.l.bf16 %v965_v51 }
  0x3b   :  { %326 = vmatprep.mubr.bf16.mxu0 %v79_v61  ;;  %390 = vmatprep.mubr.bf16.mxu1 %v95_v62 }
  0x3c   :  { %691 = vperm.xlu1 %1103, %v549_v19   ;;  %686 = vperm.xlu0 %1102, %v548_v20  }
  0x40   :  { %701 = vperm.xlu1 %1103, %v551_v23   ;;  %696 = vperm.xlu0 %1102, %v550_v24   ;;  %v932_v23 = vunpack.c.l.bf16 %v966_v13 }
  0x42   :  { %327 = vmatmul.mubr.bf16.gmra.mrb[16].mxu0 %v78_v5  ;;  %391 = vmatmul.mubr.bf16.gmra.mrb[16].mxu1 %v94_v6 }
  0x43   :  { %334 = vmatprep.mubr.bf16.mxu0 %v81_v7  ;;  %398 = vmatprep.mubr.bf16.mxu1 %v97_v8 }
  0x44   :  { %711 = vperm.xlu1 %1103, %v553_v29   ;;  %706 = vperm.xlu0 %1102, %v552_v30   ;;  %v933_v29 = vunpack.c.h.bf16 %v966_v13 }
  0x4a   :  { %335 = vmatmul.mubr.bf16.gmra.mrb[20].mxu0 %v80_v15  ;;  %399 = vmatmul.mubr.bf16.gmra.mrb[20].mxu1 %v96_v16 }
  0x4b   :  { %342 = vmatprep.mubr.bf16.mxu0 %v83_v17  ;;  %406 = vmatprep.mubr.bf16.mxu1 %v99_v18 }
  0x52   :  { %343 = vmatmul.mubr.bf16.gmra.mrb[24].mxu0 %v82_v25  ;;  %407 = vmatmul.mubr.bf16.gmra.mrb[24].mxu1 %v98_v26 }
  0x53   :  { %350 = vmatprep.mubr.bf16.mxu0 %v85_v27  ;;  %414 = vmatprep.mubr.bf16.mxu1 %v101_v28  ;;  %v901_v27 = vunpack.c.h.bf16 %v958_v12 }
  0x5a   :  { %351 = vmatmul.mubr.bf16.gmra.mrb[28].mxu0 %v84_v31  ;;  %415 = vmatmul.mubr.bf16.gmra.mrb[28].mxu1 %v100_v32 }
  0x85   :  { %v557_v33 = vpop.permute.xlu0 %556  ;;  %v1338_v34 = vpop.permute.xlu1 %566 }
  0x89   :  { %v562_v35 = vpop.permute.xlu0 %561  ;;  %v1340_v36 = vpop.permute.xlu1 %571 }
  0x8d   :  { %v1342_v37 = vpop.permute.xlu0 %576  ;;  %v1344_v38 = vpop.permute.xlu1 %581 }
  0x91   :  { %v1346_v39 = vpop.permute.xlu0 %586  ;;  %v1348_v40 = vpop.permute.xlu1 %591 }
  0x95   :  { %v1350_v41 = vpop.permute.xlu0 %596  ;;  %v1352_v42 = vpop.permute.xlu1 %601 }
  0x99   :  { %v1354_v43 = vpop.permute.xlu0 %606  ;;  %v1356_v44 = vpop.permute.xlu1 %611 }
  0x9d   :  { %v1358_v45 = vpop.permute.xlu0 %616  ;;  %v1360_v46 = vpop.permute.xlu1 %621 }
  0xa3   :  { %v1362_v47 = vpop.permute.xlu0 %626  ;;  %v1364_v48 = vpop.permute.xlu1 %631 }
  0xa7   :  { %v637_v49 = vpop.permute.xlu0 %636  ;;  %v642_v6 = vpop.permute.xlu1 %641 }
  0xab   :  { %v647_v11 = vpop.permute.xlu0 %646 }
  0xf5   :  { %v989_v52 = vpop.f32.mrb[0].mxu0  ;;  %v1037_v53 = vpop.f32.mrb[0].mxu1 }
  0xf6   :  { %v990_v54 = vpop.f32.mrb[1].mxu0  ;;  %v1038_v55 = vpop.f32.mrb[1].mxu1 }
  0xf7   :  { %v991_v56 = vadd.f32 %v990_v54, %v989_v52  ;;  %v1039_v58 = vadd.f32 %v1038_v55, %v1037_v53  ;;  %v992_v60 = vpop.f32.mrb[2].mxu0  ;;  %v1040_v61 = vpop.f32.mrb[2].mxu1  ;;  %v959_v54 = vld [vmem:[%s1527_s2 + $0x10] sm:$0xff]  }
  0xf8   :  { %v993_v62 = vpop.f32.mrb[3].mxu0  ;;  %v1041_v0 = vpop.f32.mrb[3].mxu1  ;;  %v967_v55 = vld [vmem:[%s1527_s2 + $0x50] sm:$0xff]  }
  0xf9   :  { %v714_v2 = vmul.f32 %v991_v56, %v557_v33  ;;  %v730_v3 = vmul.f32 %v1039_v58, %v637_v49  ;;  %v994_v4 = vadd.f32 %v993_v62, %v992_v60  ;;  %v1042_v5 = vadd.f32 %v1041_v0, %v1040_v61  ;;  %v657_v53 = vpop.permute.xlu0 %656 }
  0xfa   :  { %v904_v61 = vunpack.c.l.bf16 %v959_v54 }
  0xfb   :  { %v810_v7 = vadd.f32 %v896_v57, %v714_v2  ;;  %v826_v8 = vadd.f32 %v928_v59, %v730_v3  ;;  %v715_v9 = vmul.f32 %v994_v4, %v562_v35  ;;  %v731_v10 = vmul.f32 %v1042_v5, %v642_v6  ;;  %v652_v35 = vpop.permute.xlu1 %651 }
  0xfc   :  { %v905_v3 = vunpack.c.h.bf16 %v959_v54  ;;  %v937_v5 = vunpack.c.h.bf16 %v967_v55 }
  0xfd   :  { %842 = vst [vmem:[%s1528_s4] sm:$0xff] %v810_v7  ;;  %858 = vst [vmem:[%s1528_s4 + $0x80] sm:$0xff] %v826_v8  ;;  %v811_v14 = vadd.f32 %v897_v63, %v715_v9  ;;  %v827_v15 = vadd.f32 %v929_v1, %v731_v10  ;;  %v995_v16 = vpop.f32.mrb[4].mxu0  ;;  %v1043_v17 = vpop.f32.mrb[4].mxu1  ;;  %v936_v63 = vunpack.c.l.bf16 %v967_v55 }
  0xfe   :  { %v996_v18 = vpop.f32.mrb[5].mxu0  ;;  %v1044_v19 = vpop.f32.mrb[5].mxu1 }
  0xff   :  { %843 = vst [vmem:[%s1528_s4 + $0x8] sm:$0xff] %v811_v14  ;;  %859 = vst [vmem:[%s1528_s4 + $0x88] sm:$0xff] %v827_v15  ;;  %v997_v20 = vadd.f32 %v996_v18, %v995_v16  ;;  %v1045_v22 = vadd.f32 %v1044_v19, %v1043_v17  ;;  %v998_v24 = vpop.f32.mrb[6].mxu0  ;;  %v1046_v25 = vpop.f32.mrb[6].mxu1  ;;  %v960_v16 = vld [vmem:[%s1527_s2 + $0x18] sm:$0xff]  }
 0x100   :  { %v999_v26 = vpop.f32.mrb[7].mxu0  ;;  %v1047_v28 = vpop.f32.mrb[7].mxu1  ;;  %v968_v17 = vld [vmem:[%s1527_s2 + $0x58] sm:$0xff]  }
 0x101   :  { %v716_v30 = vmul.f32 %v997_v20, %v1338_v34  ;;  %v732_v31 = vmul.f32 %v1045_v22, %v647_v11  ;;  %v1000_v32 = vadd.f32 %v999_v26, %v998_v24  ;;  %v1048_v33 = vadd.f32 %v1047_v28, %v1046_v25  ;;  %v662_v10 = vpop.permute.xlu1 %661  ;;  %v667_v15 = vpop.permute.xlu0 %666 }
 0x102   :  { %v940_v25 = vunpack.c.l.bf16 %v968_v17 }
 0x103   :  { %v812_v49 = vadd.f32 %v900_v21, %v716_v30  ;;  %v828_v50 = vadd.f32 %v932_v23, %v732_v31  ;;  %v717_v51 = vmul.f32 %v1000_v32, %v1340_v36  ;;  %v733_v52 = vmul.f32 %v1048_v33, %v652_v35 }
 0x104   :  { %v908_v23 = vunpack.c.l.bf16 %v960_v16  ;;  %v941_v31 = vunpack.c.h.bf16 %v968_v17  ;;  %v970_v17 = vld [vmem:[%s1527_s2 + $0x68] sm:$0xff]  }
 0x105   :  { %844 = vst [vmem:[%s1528_s4 + $0x10] sm:$0xff] %v812_v49  ;;  %860 = vst [vmem:[%s1528_s4 + $0x90] sm:$0xff] %v828_v50  ;;  %v813_v34 = vadd.f32 %v901_v27, %v717_v51  ;;  %v829_v36 = vadd.f32 %v933_v29, %v733_v52  ;;  %v1001_v56 = vpop.f32.mrb[8].mxu0  ;;  %v1049_v57 = vpop.f32.mrb[8].mxu1  ;;  %v909_v29 = vunpack.c.h.bf16 %v960_v16  ;;  %v962_v16 = vld [vmem:[%s1527_s2 + $0x28] sm:$0xff]  }
 0x106   :  { %v1002_v58 = vpop.f32.mrb[9].mxu0  ;;  %v1050_v59 = vpop.f32.mrb[9].mxu1 }
 0x107   :  { %845 = vst [vmem:[%s1528_s4 + $0x18] sm:$0xff] %v813_v34  ;;  %861 = vst [vmem:[%s1528_s4 + $0x98] sm:$0xff] %v829_v36  ;;  %v1003_v60 = vadd.f32 %v1002_v58, %v1001_v56  ;;  %v1051_v62 = vadd.f32 %v1050_v59, %v1049_v57  ;;  %v1004_v0 = vpop.f32.mrb[10].mxu0  ;;  %v1052_v1 = vpop.f32.mrb[10].mxu1  ;;  %v961_v34 = vld [vmem:[%s1527_s2 + $0x20] sm:$0xff]  }
 0x108   :  { %v1005_v2 = vpop.f32.mrb[11].mxu0  ;;  %v1053_v4 = vpop.f32.mrb[11].mxu1  ;;  %v969_v36 = vld [vmem:[%s1527_s2 + $0x60] sm:$0xff]  }
 0x109   :  { %v718_v6 = vmul.f32 %v1003_v60, %v1342_v37  ;;  %v734_v7 = vmul.f32 %v1051_v62, %v657_v53  ;;  %v1006_v8 = vadd.f32 %v1005_v2, %v1004_v0  ;;  %v1054_v9 = vadd.f32 %v1053_v4, %v1052_v1  ;;  %v672_v50 = vpop.permute.xlu1 %671  ;;  %v677_v55 = vpop.permute.xlu0 %676 }
 0x10b   :  { %v814_v11 = vadd.f32 %v904_v61, %v718_v6  ;;  %v830_v12 = vadd.f32 %v936_v63, %v734_v7  ;;  %v719_v13 = vmul.f32 %v1006_v8, %v1344_v38  ;;  %v735_v14 = vmul.f32 %v1054_v9, %v662_v10 }
 0x10c   :  { %v912_v61 = vunpack.c.l.bf16 %v961_v34  ;;  %v944_v63 = vunpack.c.l.bf16 %v969_v36 }
 0x10d   :  { %846 = vst [vmem:[%s1528_s4 + $0x20] sm:$0xff] %v814_v11  ;;  %862 = vst [vmem:[%s1528_s4 + $0xa0] sm:$0xff] %v830_v12  ;;  %v815_v37 = vadd.f32 %v905_v3, %v719_v13  ;;  %v831_v38 = vadd.f32 %v937_v5, %v735_v14  ;;  %v1007_v18 = vpop.f32.mrb[12].mxu0  ;;  %v1055_v19 = vpop.f32.mrb[12].mxu1  ;;  %v913_v3 = vunpack.c.h.bf16 %v961_v34  ;;  %v945_v5 = vunpack.c.h.bf16 %v969_v36 }
 0x10e   :  { %v1008_v20 = vpop.f32.mrb[13].mxu0  ;;  %v1056_v21 = vpop.f32.mrb[13].mxu1 }
 0x10f   :  { %847 = vst [vmem:[%s1528_s4 + $0x28] sm:$0xff] %v815_v37  ;;  %863 = vst [vmem:[%s1528_s4 + $0xa8] sm:$0xff] %v831_v38  ;;  %v1009_v22 = vadd.f32 %v1008_v20, %v1007_v18  ;;  %v1057_v24 = vadd.f32 %v1056_v21, %v1055_v19  ;;  %v1010_v26 = vpop.f32.mrb[14].mxu0  ;;  %v1058_v27 = vpop.f32.mrb[14].mxu1  ;;  %v916_v21 = vunpack.c.l.bf16 %v962_v16 }
 0x110   :  { %v1011_v28 = vpop.f32.mrb[15].mxu0  ;;  %v1059_v30 = vpop.f32.mrb[15].mxu1 }
 0x111   :  { %v720_v32 = vmul.f32 %v1009_v22, %v1346_v39  ;;  %v736_v33 = vmul.f32 %v1057_v24, %v667_v15  ;;  %v1012_v35 = vadd.f32 %v1011_v28, %v1010_v26  ;;  %v1060_v49 = vadd.f32 %v1059_v30, %v1058_v27  ;;  %v682_v10 = vpop.permute.xlu1 %681  ;;  %v687_v15 = vpop.permute.xlu0 %686 }
 0x112   :  { %v917_v27 = vunpack.c.h.bf16 %v962_v16 }
 0x113   :  { %v816_v51 = vadd.f32 %v908_v23, %v720_v32  ;;  %v832_v52 = vadd.f32 %v940_v25, %v736_v33  ;;  %v721_v53 = vmul.f32 %v1012_v35, %v1348_v40  ;;  %v737_v54 = vmul.f32 %v1060_v49, %v672_v50 }
 0x114   :  { %v948_v23 = vunpack.c.l.bf16 %v970_v17 }
 0x115   :  { %848 = vst [vmem:[%s1528_s4 + $0x30] sm:$0xff] %v816_v51  ;;  %864 = vst [vmem:[%s1528_s4 + $0xb0] sm:$0xff] %v832_v52  ;;  %v817_v39 = vadd.f32 %v909_v29, %v721_v53  ;;  %v833_v40 = vadd.f32 %v941_v31, %v737_v54  ;;  %v1013_v56 = vpop.f32.mrb[16].mxu0  ;;  %v1061_v57 = vpop.f32.mrb[16].mxu1  ;;  %v949_v29 = vunpack.c.h.bf16 %v970_v17  ;;  %v963_v54 = vld [vmem:[%s1527_s2 + $0x30] sm:$0xff]  }
 0x116   :  { %v1014_v58 = vpop.f32.mrb[17].mxu0  ;;  %v1062_v59 = vpop.f32.mrb[17].mxu1 }
 0x117   :  { %849 = vst [vmem:[%s1528_s4 + $0x38] sm:$0xff] %v817_v39  ;;  %865 = vst [vmem:[%s1528_s4 + $0xb8] sm:$0xff] %v833_v40  ;;  %v1015_v60 = vadd.f32 %v1014_v58, %v1013_v56  ;;  %v1063_v62 = vadd.f32 %v1062_v59, %v1061_v57  ;;  %v1016_v0 = vpop.f32.mrb[18].mxu0  ;;  %v1064_v1 = vpop.f32.mrb[18].mxu1  ;;  %v920_v57 = vunpack.c.l.bf16 %v963_v54 }
 0x118   :  { %v1017_v2 = vpop.f32.mrb[19].mxu0  ;;  %v1065_v4 = vpop.f32.mrb[19].mxu1 }
 0x119   :  { %v722_v6 = vmul.f32 %v1015_v60, %v1350_v41  ;;  %v738_v7 = vmul.f32 %v1063_v62, %v677_v55  ;;  %v1018_v8 = vadd.f32 %v1017_v2, %v1016_v0  ;;  %v1066_v9 = vadd.f32 %v1065_v4, %v1064_v1  ;;  %v692_v35 = vpop.permute.xlu1 %691  ;;  %v697_v53 = vpop.permute.xlu0 %696  ;;  %v971_v55 = vld [vmem:[%s1527_s2 + $0x70] sm:$0xff]  }
 0x11a   :  { %v952_v59 = vunpack.c.l.bf16 %v971_v55  ;;  %v953_v1 = vunpack.c.h.bf16 %v971_v55 }
 0x11b   :  { %v818_v11 = vadd.f32 %v912_v61, %v722_v6  ;;  %v834_v12 = vadd.f32 %v944_v63, %v738_v7  ;;  %v723_v13 = vmul.f32 %v1018_v8, %v1352_v42  ;;  %v739_v14 = vmul.f32 %v1066_v9, %v682_v10 }
 0x11c   :  { %v921_v63 = vunpack.c.h.bf16 %v963_v54 }
 0x11d   :  { %850 = vst [vmem:[%s1528_s4 + $0x40] sm:$0xff] %v818_v11  ;;  %866 = vst [vmem:[%s1528_s4 + $0xc0] sm:$0xff] %v834_v12  ;;  %v819_v41 = vadd.f32 %v913_v3, %v723_v13  ;;  %v835_v42 = vadd.f32 %v945_v5, %v739_v14  ;;  %v1019_v37 = vpop.f32.mrb[20].mxu0  ;;  %v1067_v38 = vpop.f32.mrb[20].mxu1  ;;  %v964_v12 = vld [vmem:[%s1527_s2 + $0x38] sm:$0xff]  }
 0x11e   :  { %v1020_v18 = vpop.f32.mrb[21].mxu0  ;;  %v1068_v19 = vpop.f32.mrb[21].mxu1  ;;  %v972_v13 = vld [vmem:[%s1527_s2 + $0x78] sm:$0xff]  }
 0x11f   :  { %851 = vst [vmem:[%s1528_s4 + $0x48] sm:$0xff] %v819_v41  ;;  %867 = vst [vmem:[%s1528_s4 + $0xc8] sm:$0xff] %v835_v42  ;;  %v1021_v20 = vadd.f32 %v1020_v18, %v1019_v37  ;;  %v1069_v22 = vadd.f32 %v1068_v19, %v1067_v38  ;;  %v1022_v24 = vpop.f32.mrb[22].mxu0  ;;  %v1070_v25 = vpop.f32.mrb[22].mxu1  ;;  %v924_v42 = vunpack.c.l.bf16 %v964_v12  ;;  %v956_v38 = vunpack.c.l.bf16 %v972_v13 }
 0x120   :  { %v1023_v26 = vpop.f32.mrb[23].mxu0  ;;  %v1071_v28 = vpop.f32.mrb[23].mxu1 }
 0x121   :  { %v724_v30 = vmul.f32 %v1021_v20, %v1354_v43  ;;  %v740_v31 = vmul.f32 %v1069_v22, %v687_v15  ;;  %v1024_v32 = vadd.f32 %v1023_v26, %v1022_v24  ;;  %v1072_v33 = vadd.f32 %v1071_v28, %v1070_v25  ;;  %v702_v6 = vpop.permute.xlu1 %701  ;;  %v707_v11 = vpop.permute.xlu0 %706 }
 0x123   :  { %v820_v49 = vadd.f32 %v916_v21, %v724_v30  ;;  %v836_v50 = vadd.f32 %v948_v23, %v740_v31  ;;  %v725_v51 = vmul.f32 %v1024_v32, %v1356_v44  ;;  %v741_v52 = vmul.f32 %v1072_v33, %v692_v35 }
 0x124   :  { %v925_v21 = vunpack.c.h.bf16 %v964_v12  ;;  %v957_v23 = vunpack.c.h.bf16 %v972_v13 }
 0x125   :  { %852 = vst [vmem:[%s1528_s4 + $0x50] sm:$0xff] %v820_v49  ;;  %868 = vst [vmem:[%s1528_s4 + $0xd0] sm:$0xff] %v836_v50  ;;  %v821_v43 = vadd.f32 %v917_v27, %v725_v51  ;;  %v837_v44 = vadd.f32 %v949_v29, %v741_v52  ;;  %v1025_v34 = vpop.f32.mrb[24].mxu0  ;;  %v1073_v36 = vpop.f32.mrb[24].mxu1 }
 0x126   :  { %v1026_v39 = vpop.f32.mrb[25].mxu0  ;;  %v1074_v40 = vpop.f32.mrb[25].mxu1 }
 0x127   :  { %853 = vst [vmem:[%s1528_s4 + $0x58] sm:$0xff] %v821_v43  ;;  %869 = vst [vmem:[%s1528_s4 + $0xd8] sm:$0xff] %v837_v44  ;;  %v1027_v56 = vadd.f32 %v1026_v39, %v1025_v34  ;;  %v1075_v58 = vadd.f32 %v1074_v40, %v1073_v36  ;;  %v1028_v60 = vpop.f32.mrb[26].mxu0  ;;  %v1076_v61 = vpop.f32.mrb[26].mxu1 }
 0x128   :  { %v1029_v62 = vpop.f32.mrb[27].mxu0  ;;  %v1077_v0 = vpop.f32.mrb[27].mxu1 }
 0x129   :  { %v726_v2 = vmul.f32 %v1027_v56, %v1358_v45  ;;  %v742_v3 = vmul.f32 %v1075_v58, %v697_v53  ;;  %v1030_v4 = vadd.f32 %v1029_v62, %v1028_v60  ;;  %v1078_v5 = vadd.f32 %v1077_v0, %v1076_v61  ;;  %v712_v28 = vpop.permute.xlu1 %711 }
 0x12b   :  { %v822_v7 = vadd.f32 %v920_v57, %v726_v2  ;;  %v838_v8 = vadd.f32 %v952_v59, %v742_v3  ;;  %v727_v9 = vmul.f32 %v1030_v4, %v1360_v46  ;;  %v743_v10 = vmul.f32 %v1078_v5, %v702_v6 }
 0x12d   :  { %854 = vst [vmem:[%s1528_s4 + $0x60] sm:$0xff] %v822_v7  ;;  %870 = vst [vmem:[%s1528_s4 + $0xe0] sm:$0xff] %v838_v8  ;;  %v823_v45 = vadd.f32 %v921_v63, %v727_v9  ;;  %v839_v46 = vadd.f32 %v953_v1, %v743_v10  ;;  %v1031_v14 = vpop.f32.mrb[28].mxu0  ;;  %v1079_v15 = vpop.f32.mrb[28].mxu1 }
 0x12e   :  { %v1032_v16 = vpop.f32.mrb[29].mxu0  ;;  %v1080_v17 = vpop.f32.mrb[29].mxu1 }
 0x12f   :  { %855 = vst [vmem:[%s1528_s4 + $0x68] sm:$0xff] %v823_v45  ;;  %871 = vst [vmem:[%s1528_s4 + $0xe8] sm:$0xff] %v839_v46  ;;  %v1033_v41 = vadd.f32 %v1032_v16, %v1031_v14  ;;  %v1081_v37 = vadd.f32 %v1080_v17, %v1079_v15  ;;  %v1034_v18 = vpop.f32.mrb[30].mxu0  ;;  %v1082_v19 = vpop.f32.mrb[30].mxu1 }
 0x130   :  { %v1035_v20 = vpop.f32.mrb[31].mxu0  ;;  %v1083_v22 = vpop.f32.mrb[31].mxu1 }
 0x131   :  { %v728_v24 = vmul.f32 %v1033_v41, %v1362_v47  ;;  %v744_v25 = vmul.f32 %v1081_v37, %v707_v11  ;;  %v1036_v26 = vadd.f32 %v1035_v20, %v1034_v18  ;;  %v1084_v27 = vadd.f32 %v1083_v22, %v1082_v19 }
 0x133   :  { %v824_v29 = vadd.f32 %v924_v42, %v728_v24  ;;  %v840_v30 = vadd.f32 %v956_v38, %v744_v25  ;;  %v729_v31 = vmul.f32 %v1036_v26, %v1364_v48  ;;  %v745_v32 = vmul.f32 %v1084_v27, %v712_v28 }
 0x135   :  { %856 = vst [vmem:[%s1528_s4 + $0x70] sm:$0xff] %v824_v29  ;;  %872 = vst [vmem:[%s1528_s4 + $0xf0] sm:$0xff] %v840_v30  ;;  %v825_v33 = vadd.f32 %v925_v21, %v729_v31  ;;  %v841_v35 = vadd.f32 %v957_v23, %v745_v32 }
 0x137   :  { %857 = vst [vmem:[%s1528_s4 + $0x78] sm:$0xff] %v825_v33  ;;  %873 = vst [vmem:[%s1528_s4 + $0xf8] sm:$0xff] %v841_v35 }

// kernel: graphsagex_forward.7
= control target key start
LH: loop header
LB: loop body
LE: loop exit
PB: predicated region body
PF: predicated region fallthrough
CT: control target
= control target key end

     0   :  { %v1439_v1 = vmov 0   ;;  %s1795_s1 = inlined_call_operand.vmem [shape: bf16[256,128], index: 1, kind: input, shape index: {}]   ;;  %s1796_s0 = inlined_call_operand.vmem [shape: s8[256,256], index: 0, kind: input, shape index: {}]   ;;  %s1797_s3 = inlined_call_operand.vmem [shape: f32[256,1], index: 3, kind: input, shape index: {}]   ;;  %s1798_s2 = inlined_call_operand.vmem [shape: bf16[256,128], index: 2, kind: input, shape index: {}]   ;;  %s1799_s4 = inlined_call_operand.vmem [shape: bf16[256,128], index: 4, kind: output, shape index: {}]  }
   0x1   :  { %v1423_v0 = vld [vmem:[%s1795_s1 + $0x40] sm:$0xff]   ;;  %1422 = vset.pattern.permute.xlu1 %v1439_v1  ;;  %1421 = vset.pattern.permute.xlu0 %v1439_v1  ;;  %v1425_v3 = vld [vmem:[%s1795_s1 + $0x48] sm:$0xff]   ;;  %v1427_v5 = vld [vmem:[%s1795_s1 + $0x50] sm:$0xff]  }
   0x2   :  { %v1424_v2 = vld [vmem:[%s1795_s1] sm:$0xff]   ;;  %1292 = vmatprep.subr.bf16.mxu0 %v1423_v0  ;;  %1404 = vmatprep.subr.bf16.mxu1 %v1423_v0  ;;  %v1426_v4 = vld [vmem:[%s1795_s1 + $0x8] sm:$0xff]   ;;  %v1428_v6 = vld [vmem:[%s1795_s1 + $0x10] sm:$0xff]  }
   0x3   :  { %1293 = vmatpush3.bf16.msra.mxu0 %v1424_v2  ;;  %1412 = vmatpush3.bf16.msra.mxu1 %v1424_v2  ;;  %v1429_v7 = vld [vmem:[%s1795_s1 + $0x58] sm:$0xff]   ;;  %v1431_v9 = vld [vmem:[%s1795_s1 + $0x60] sm:$0xff]   ;;  %v1433_v11 = vld [vmem:[%s1795_s1 + $0x68] sm:$0xff]  }
   0x4   :  { %1294 = vmatprep.subr.bf16.mxu0 %v1425_v3  ;;  %1405 = vmatprep.subr.bf16.mxu1 %v1425_v3  ;;  %v1430_v8 = vld [vmem:[%s1795_s1 + $0x18] sm:$0xff]   ;;  %v1432_v10 = vld [vmem:[%s1795_s1 + $0x20] sm:$0xff]   ;;  %v55_v12 = vld [vmem:[%s1796_s0 + $0x8] sm:$0xff] }
   0x5   :  { %v63_v13 = vld [vmem:[%s1796_s0 + $0x48] sm:$0xff]  ;;  %v71_v14 = vunpack.c.l.s8.bf16 %v55_v12  ;;  %v524_v17 = vld [vmem:[%s1797_s3 + $0x10] sm:$0xff]  ;;  %v522_v18 = vld [vmem:[%s1797_s3] sm:$0xff]  ;;  %v73_v31 = vunpack.c.h.s8.bf16 %v55_v12 }
   0x6   :  { %v87_v15 = vunpack.c.l.s8.bf16 %v63_v13  ;;  %v1434_v16 = vld [vmem:[%s1795_s1 + $0x28] sm:$0xff]   ;;  %v1435_v19 = vld [vmem:[%s1795_s1 + $0x70] sm:$0xff]   ;;  %566 = vperm.xlu1 %1422, %v524_v17   ;;  %556 = vperm.xlu0 %1421, %v522_v18   ;;  %v525_v21 = vld [vmem:[%s1797_s3 + $0x18] sm:$0xff]  ;;  %v89_v32 = vunpack.c.h.s8.bf16 %v63_v13 }
   0x7   :  { %1295 = vmatpush3.bf16.msra.mxu0 %v1426_v4  ;;  %1413 = vmatpush3.bf16.msra.mxu1 %v1426_v4  ;;  %v1436_v20 = vld [vmem:[%s1795_s1 + $0x30] sm:$0xff]   ;;  %v523_v22 = vld [vmem:[%s1797_s3 + $0x8] sm:$0xff]  ;;  %v1437_v23 = vld [vmem:[%s1795_s1 + $0x78] sm:$0xff]  }
   0x8   :  { %1296 = vmatprep.subr.bf16.mxu0 %v1427_v5  ;;  %1406 = vmatprep.subr.bf16.mxu1 %v1427_v5  ;;  %v1438_v24 = vld [vmem:[%s1795_s1 + $0x38] sm:$0xff]   ;;  %v54_v25 = vld [vmem:[%s1796_s0] sm:$0xff]  ;;  %v527_v27 = vld [vmem:[%s1797_s3 + $0x28] sm:$0xff] }
   0x9   :  { %294 = vmatprep.mubr.bf16.mxu0 %v71_v14  ;;  %358 = vmatprep.mubr.bf16.mxu1 %v87_v15  ;;  %v62_v26 = vld [vmem:[%s1796_s0 + $0x40] sm:$0xff]  ;;  %v70_v29 = vunpack.c.l.s8.bf16 %v54_v25  ;;  %v529_v33 = vld [vmem:[%s1797_s3 + $0x38] sm:$0xff]  ;;  %v528_v34 = vld [vmem:[%s1797_s3 + $0x30] sm:$0xff]  ;;  %v72_v39 = vunpack.c.h.s8.bf16 %v54_v25 }
   0xa   :  { %571 = vperm.xlu1 %1422, %v525_v21   ;;  %561 = vperm.xlu0 %1421, %v523_v22   ;;  %v526_v28 = vld [vmem:[%s1797_s3 + $0x20] sm:$0xff]  ;;  %v86_v30 = vunpack.c.l.s8.bf16 %v62_v26  ;;  %v57_v35 = vld [vmem:[%s1796_s0 + $0x18] sm:$0xff]  ;;  %v531_v37 = vld [vmem:[%s1797_s3 + $0x48] sm:$0xff]  ;;  %v88_v40 = vunpack.c.h.s8.bf16 %v62_v26 }
   0xb   :  { %1297 = vmatpush3.bf16.msra.mxu0 %v1428_v6  ;;  %1414 = vmatpush3.bf16.msra.mxu1 %v1428_v6  ;;  %v65_v36 = vld [vmem:[%s1796_s0 + $0x58] sm:$0xff]  ;;  %v530_v38 = vld [vmem:[%s1797_s3 + $0x40] sm:$0xff]  ;;  %v75_v41 = vunpack.c.l.s8.bf16 %v57_v35  ;;  %v532_v44 = vld [vmem:[%s1797_s3 + $0x50] sm:$0xff]  ;;  %v77_v51 = vunpack.c.h.s8.bf16 %v57_v35 }
   0xc   :  { %1298 = vmatprep.subr.bf16.mxu0 %v1429_v7  ;;  %1407 = vmatprep.subr.bf16.mxu1 %v1429_v7  ;;  %v91_v42 = vunpack.c.l.s8.bf16 %v65_v36  ;;  %v533_v43 = vld [vmem:[%s1797_s3 + $0x58] sm:$0xff]  ;;  %v56_v45 = vld [vmem:[%s1796_s0 + $0x10] sm:$0xff]  ;;  %v535_v47 = vld [vmem:[%s1797_s3 + $0x68] sm:$0xff]  ;;  %v93_v52 = vunpack.c.h.s8.bf16 %v65_v36 }
   0xd   :  { %v64_v46 = vld [vmem:[%s1796_s0 + $0x50] sm:$0xff]  ;;  %v534_v48 = vld [vmem:[%s1797_s3 + $0x60] sm:$0xff]  ;;  %v74_v49 = vunpack.c.l.s8.bf16 %v56_v45  ;;  %v537_v53 = vld [vmem:[%s1797_s3 + $0x78] sm:$0xff]  ;;  %v76_v59 = vunpack.c.h.s8.bf16 %v56_v45 }
   0xe   :  { %581 = vperm.xlu1 %1422, %v527_v27   ;;  %576 = vperm.xlu0 %1421, %v526_v28   ;;  %v90_v50 = vunpack.c.l.s8.bf16 %v64_v46  ;;  %v536_v54 = vld [vmem:[%s1797_s3 + $0x70] sm:$0xff]  ;;  %v59_v55 = vld [vmem:[%s1796_s0 + $0x28] sm:$0xff]  ;;  %v538_v58 = vld [vmem:[%s1797_s3 + $0x80] sm:$0xff]  ;;  %v92_v60 = vunpack.c.h.s8.bf16 %v64_v46 }
   0xf   :  { %1299 = vmatpush3.bf16.msra.mxu0 %v1430_v8  ;;  %1415 = vmatpush3.bf16.msra.mxu1 %v1430_v8  ;;  %v67_v56 = vld [vmem:[%s1796_s0 + $0x68] sm:$0xff]  ;;  %v79_v61 = vunpack.c.l.s8.bf16 %v59_v55  ;;  %v541_v63 = vld [vmem:[%s1797_s3 + $0x98] sm:$0xff]  ;;  %v540_v0 = vld [vmem:[%s1797_s3 + $0x90] sm:$0xff]  ;;  %v81_v7 = vunpack.c.h.s8.bf16 %v59_v55 }
  0x10   :  { %1300 = vmatprep.subr.bf16.mxu0 %v1431_v9  ;;  %1408 = vmatprep.subr.bf16.mxu1 %v1431_v9  ;;  %v539_v57 = vld [vmem:[%s1797_s3 + $0x88] sm:$0xff]  ;;  %v95_v62 = vunpack.c.l.s8.bf16 %v67_v56  ;;  %v58_v1 = vld [vmem:[%s1796_s0 + $0x20] sm:$0xff]  ;;  %v97_v8 = vunpack.c.h.s8.bf16 %v67_v56  ;;  %v545_v9 = vld [vmem:[%s1797_s3 + $0xb8] sm:$0xff] }
  0x11   :  { %v66_v2 = vld [vmem:[%s1796_s0 + $0x60] sm:$0xff]  ;;  %v543_v3 = vld [vmem:[%s1797_s3 + $0xa8] sm:$0xff]  ;;  %v78_v5 = vunpack.c.l.s8.bf16 %v58_v1  ;;  %v69_v12 = vld [vmem:[%s1796_s0 + $0x78] sm:$0xff]  ;;  %v80_v15 = vunpack.c.h.s8.bf16 %v58_v1 }
  0x12   :  { %591 = vperm.xlu1 %1422, %v529_v33   ;;  %586 = vperm.xlu0 %1421, %v528_v34   ;;  %v542_v4 = vld [vmem:[%s1797_s3 + $0xa0] sm:$0xff]  ;;  %v94_v6 = vunpack.c.l.s8.bf16 %v66_v2  ;;  %v547_v13 = vld [vmem:[%s1797_s3 + $0xc8] sm:$0xff]  ;;  %v99_v18 = vunpack.c.l.s8.bf16 %v69_v12  ;;  %v60_v21 = vld [vmem:[%s1796_s0 + $0x30] sm:$0xff]  ;;  %v101_v28 = vunpack.c.h.s8.bf16 %v69_v12 }
  0x13   :  { %1301 = vmatpush3.bf16.msra.mxu0 %v1432_v10  ;;  %1416 = vmatpush3.bf16.msra.mxu1 %v1432_v10  ;;  %v544_v10 = vld [vmem:[%s1797_s3 + $0xb0] sm:$0xff]  ;;  %v546_v14 = vld [vmem:[%s1797_s3 + $0xc0] sm:$0xff]  ;;  %v82_v25 = vunpack.c.l.s8.bf16 %v60_v21 }
  0x14   :  { %1302 = vmatprep.subr.bf16.mxu0 %v1433_v11  ;;  %1409 = vmatprep.subr.bf16.mxu1 %v1433_v11  ;;  %v61_v11 = vld [vmem:[%s1796_s0 + $0x38] sm:$0xff]  ;;  %v68_v22 = vld [vmem:[%s1796_s0 + $0x70] sm:$0xff] }
  0x15   :  { %v83_v17 = vunpack.c.l.s8.bf16 %v61_v11  ;;  %v98_v26 = vunpack.c.l.s8.bf16 %v68_v22  ;;  %v85_v27 = vunpack.c.h.s8.bf16 %v61_v11 }
  0x16   :  { %601 = vperm.xlu1 %1422, %v531_v37   ;;  %596 = vperm.xlu0 %1421, %v530_v38  }
  0x17   :  { %1303 = vmatpush3.bf16.msra.mxu0 %v1434_v16  ;;  %1417 = vmatpush3.bf16.msra.mxu1 %v1434_v16  ;;  %v96_v16 = vunpack.c.h.s8.bf16 %v66_v2 }
  0x18   :  { %1304 = vmatprep.subr.bf16.mxu0 %v1435_v19  ;;  %1410 = vmatprep.subr.bf16.mxu1 %v1435_v19  ;;  %v549_v19 = vld [vmem:[%s1797_s3 + $0xd8] sm:$0xff] }
  0x1a   :  { %611 = vperm.xlu1 %1422, %v533_v43   ;;  %606 = vperm.xlu0 %1421, %v532_v44  }
  0x1b   :  { %1305 = vmatpush3.bf16.msra.mxu0 %v1436_v20  ;;  %1418 = vmatpush3.bf16.msra.mxu1 %v1436_v20  ;;  %v548_v20 = vld [vmem:[%s1797_s3 + $0xd0] sm:$0xff] }
  0x1c   :  { %1306 = vmatprep.subr.bf16.mxu0 %v1437_v23  ;;  %1411 = vmatprep.subr.bf16.mxu1 %v1437_v23  ;;  %v551_v23 = vld [vmem:[%s1797_s3 + $0xe8] sm:$0xff] }
  0x1e   :  { %621 = vperm.xlu1 %1422, %v535_v47   ;;  %616 = vperm.xlu0 %1421, %v534_v48  }
  0x1f   :  { %1307 = vmatpush3.bf16.msra.mxu0 %v1438_v24  ;;  %1419 = vmatpush3.bf16.msra.mxu1 %v1438_v24  ;;  %v550_v24 = vld [vmem:[%s1797_s3 + $0xe0] sm:$0xff] }
  0x22   :  { %295 = vmatmul.mubr.bf16.vlgmr.msra.gmra.mrb[0].mxu0 %v70_v29  ;;  %359 = vmatmul.mubr.bf16.vlgmr.msra.gmra.mrb[0].mxu1 %v86_v30  ;;  %v553_v29 = vld [vmem:[%s1797_s3 + $0xf8] sm:$0xff]  ;;  %v552_v30 = vld [vmem:[%s1797_s3 + $0xf0] sm:$0xff] }
  0x23   :  { %302 = vmatprep.mubr.bf16.mxu0 %v73_v31  ;;  %366 = vmatprep.mubr.bf16.mxu1 %v89_v32  ;;  %v84_v31 = vunpack.c.h.s8.bf16 %v60_v21  ;;  %v100_v32 = vunpack.c.h.s8.bf16 %v68_v22 }
  0x24   :  { %631 = vperm.xlu1 %1422, %v537_v53   ;;  %626 = vperm.xlu0 %1421, %v536_v54  }
  0x28   :  { %641 = vperm.xlu1 %1422, %v539_v57   ;;  %636 = vperm.xlu0 %1421, %v538_v58  }
  0x2a   :  { %303 = vmatmul.mubr.bf16.gmra.mrb[4].mxu0 %v72_v39  ;;  %367 = vmatmul.mubr.bf16.gmra.mrb[4].mxu1 %v88_v40 }
  0x2b   :  { %310 = vmatprep.mubr.bf16.mxu0 %v75_v41  ;;  %374 = vmatprep.mubr.bf16.mxu1 %v91_v42 }
  0x2c   :  { %651 = vperm.xlu1 %1422, %v541_v63   ;;  %646 = vperm.xlu0 %1421, %v540_v0  }
  0x30   :  { %661 = vperm.xlu1 %1422, %v543_v3   ;;  %656 = vperm.xlu0 %1421, %v542_v4  }
  0x32   :  { %311 = vmatmul.mubr.bf16.gmra.mrb[8].mxu0 %v74_v49  ;;  %375 = vmatmul.mubr.bf16.gmra.mrb[8].mxu1 %v90_v50  ;;  %v1119_v50 = vld [vmem:[%s1798_s2] sm:$0xff]  }
  0x33   :  { %318 = vmatprep.mubr.bf16.mxu0 %v77_v51  ;;  %382 = vmatprep.mubr.bf16.mxu1 %v93_v52  ;;  %v1269_v51 = vld [vmem:[%s1798_s2 + $0x40] sm:$0xff]   ;;  %v1120_v57 = vunpack.c.l.bf16 %v1119_v50  ;;  %v1121_v63 = vunpack.c.h.bf16 %v1119_v50 }
  0x34   :  { %671 = vperm.xlu1 %1422, %v545_v9   ;;  %666 = vperm.xlu0 %1421, %v544_v10   ;;  %v1153_v1 = vunpack.c.h.bf16 %v1269_v51 }
  0x38   :  { %681 = vperm.xlu1 %1422, %v547_v13   ;;  %676 = vperm.xlu0 %1421, %v546_v14  }
  0x3a   :  { %319 = vmatmul.mubr.bf16.gmra.mrb[12].mxu0 %v76_v59  ;;  %383 = vmatmul.mubr.bf16.gmra.mrb[12].mxu1 %v92_v60  ;;  %v1152_v59 = vunpack.c.l.bf16 %v1269_v51 }
  0x3b   :  { %326 = vmatprep.mubr.bf16.mxu0 %v79_v61  ;;  %390 = vmatprep.mubr.bf16.mxu1 %v95_v62 }
  0x3c   :  { %691 = vperm.xlu1 %1422, %v549_v19   ;;  %686 = vperm.xlu0 %1421, %v548_v20  }
  0x40   :  { %701 = vperm.xlu1 %1422, %v551_v23   ;;  %696 = vperm.xlu0 %1421, %v550_v24  }
  0x42   :  { %327 = vmatmul.mubr.bf16.gmra.mrb[16].mxu0 %v78_v5  ;;  %391 = vmatmul.mubr.bf16.gmra.mrb[16].mxu1 %v94_v6 }
  0x43   :  { %334 = vmatprep.mubr.bf16.mxu0 %v81_v7  ;;  %398 = vmatprep.mubr.bf16.mxu1 %v97_v8 }
  0x44   :  { %711 = vperm.xlu1 %1422, %v553_v29   ;;  %706 = vperm.xlu0 %1421, %v552_v30  }
  0x4a   :  { %335 = vmatmul.mubr.bf16.gmra.mrb[20].mxu0 %v80_v15  ;;  %399 = vmatmul.mubr.bf16.gmra.mrb[20].mxu1 %v96_v16  ;;  %v1262_v16 = vld [vmem:[%s1798_s2 + $0x8] sm:$0xff]  }
  0x4b   :  { %342 = vmatprep.mubr.bf16.mxu0 %v83_v17  ;;  %406 = vmatprep.mubr.bf16.mxu1 %v99_v18  ;;  %v1270_v17 = vld [vmem:[%s1798_s2 + $0x48] sm:$0xff]   ;;  %v1125_v51 = vunpack.c.h.bf16 %v1262_v16 }
  0x4c   :  { %v1156_v29 = vunpack.c.l.bf16 %v1270_v17 }
  0x52   :  { %343 = vmatmul.mubr.bf16.gmra.mrb[24].mxu0 %v82_v25  ;;  %407 = vmatmul.mubr.bf16.gmra.mrb[24].mxu1 %v98_v26 }
  0x53   :  { %350 = vmatprep.mubr.bf16.mxu0 %v85_v27  ;;  %414 = vmatprep.mubr.bf16.mxu1 %v101_v28  ;;  %v1124_v28 = vunpack.c.l.bf16 %v1262_v16 }
  0x5a   :  { %351 = vmatmul.mubr.bf16.gmra.mrb[28].mxu0 %v84_v31  ;;  %415 = vmatmul.mubr.bf16.gmra.mrb[28].mxu1 %v100_v32 }
  0x85   :  { %v557_v33 = vpop.permute.xlu0 %556  ;;  %v1657_v34 = vpop.permute.xlu1 %566 }
  0x89   :  { %v562_v35 = vpop.permute.xlu0 %561  ;;  %v1659_v36 = vpop.permute.xlu1 %571 }
  0x8d   :  { %v1661_v37 = vpop.permute.xlu0 %576  ;;  %v1663_v38 = vpop.permute.xlu1 %581 }
  0x91   :  { %v1665_v39 = vpop.permute.xlu0 %586  ;;  %v1667_v40 = vpop.permute.xlu1 %591 }
  0x95   :  { %v1669_v41 = vpop.permute.xlu0 %596  ;;  %v1671_v42 = vpop.permute.xlu1 %601 }
  0x99   :  { %v1673_v43 = vpop.permute.xlu0 %606  ;;  %v1675_v44 = vpop.permute.xlu1 %611 }
  0x9d   :  { %v1677_v45 = vpop.permute.xlu0 %616  ;;  %v1679_v46 = vpop.permute.xlu1 %621 }
  0xa3   :  { %v1681_v47 = vpop.permute.xlu0 %626  ;;  %v1683_v48 = vpop.permute.xlu1 %631 }
  0xa7   :  { %v637_v49 = vpop.permute.xlu0 %636  ;;  %v642_v6 = vpop.permute.xlu1 %641 }
  0xab   :  { %v647_v11 = vpop.permute.xlu0 %646 }
  0xf5   :  { %v1308_v52 = vpop.f32.mrb[0].mxu0  ;;  %v1356_v53 = vpop.f32.mrb[0].mxu1 }
  0xf6   :  { %v1309_v54 = vpop.f32.mrb[1].mxu0  ;;  %v1357_v55 = vpop.f32.mrb[1].mxu1 }
  0xf7   :  { %v1310_v56 = vadd.f32 %v1309_v54, %v1308_v52  ;;  %v1358_v58 = vadd.f32 %v1357_v55, %v1356_v53  ;;  %v1311_v60 = vpop.f32.mrb[2].mxu0  ;;  %v1359_v61 = vpop.f32.mrb[2].mxu1  ;;  %v1157_v53 = vunpack.c.h.bf16 %v1270_v17  ;;  %v1263_v55 = vld [vmem:[%s1798_s2 + $0x10] sm:$0xff]  }
  0xf8   :  { %v1312_v62 = vpop.f32.mrb[3].mxu0  ;;  %v1360_v0 = vpop.f32.mrb[3].mxu1 }
  0xf9   :  { %v714_v2 = vmul.f32 %v1310_v56, %v557_v33  ;;  %v730_v3 = vmul.f32 %v1358_v58, %v637_v49  ;;  %v1313_v4 = vadd.f32 %v1312_v62, %v1311_v60  ;;  %v1361_v5 = vadd.f32 %v1360_v0, %v1359_v61  ;;  %v652_v54 = vpop.permute.xlu1 %651  ;;  %v657_v56 = vpop.permute.xlu0 %656 }
  0xfb   :  { %v810_v7 = vadd.f32 %v1120_v57, %v714_v2  ;;  %v826_v8 = vadd.f32 %v1152_v59, %v730_v3  ;;  %v715_v9 = vmul.f32 %v1313_v4, %v562_v35  ;;  %v731_v10 = vmul.f32 %v1361_v5, %v642_v6 }
  0xfc   :  { %v1128_v2 = vunpack.c.l.bf16 %v1263_v55 }
  0xfd   :  { %v811_v12 = vadd.f32 %v1121_v63, %v715_v9  ;;  %v827_v13 = vadd.f32 %v1153_v1, %v731_v10  ;;  %v1314_v14 = vpop.f32.mrb[4].mxu0  ;;  %v1362_v15 = vpop.f32.mrb[4].mxu1  ;;  %v842_v18 = vmax.f32 %v810_v7, 0.0  ;;  %v858_v19 = vmax.f32 %v826_v8, 0.0 }
  0xfe   :  { %v1315_v20 = vpop.f32.mrb[5].mxu0  ;;  %v1363_v21 = vpop.f32.mrb[5].mxu1  ;;  %v1129_v9 = vunpack.c.h.bf16 %v1263_v55 }
  0xff   :  { %v843_v22 = vmax.f32 %v811_v12, 0.0  ;;  %v859_v23 = vmax.f32 %v827_v13, 0.0  ;;  %v1316_v24 = vadd.f32 %v1315_v20, %v1314_v14  ;;  %v1364_v25 = vadd.f32 %v1363_v21, %v1362_v15  ;;  %v1317_v26 = vpop.f32.mrb[6].mxu0  ;;  %v1365_v27 = vpop.f32.mrb[6].mxu1 }
 0x100   :  { %v1318_v30 = vpop.f32.mrb[7].mxu0  ;;  %v1366_v31 = vpop.f32.mrb[7].mxu1 }
 0x101   :  { %v1185_v32 = vpack.c.bf16 %v843_v22, %v842_v18  ;;  %v1225_v33 = vpack.c.bf16 %v859_v23, %v858_v19  ;;  %v716_v35 = vmul.f32 %v1316_v24, %v1657_v34  ;;  %v732_v49 = vmul.f32 %v1364_v25, %v647_v11  ;;  %v1271_v34 = vld [vmem:[%s1798_s2 + $0x50] sm:$0xff]   ;;  %v662_v20 = vpop.permute.xlu1 %661 }
 0x102   :  { %v1319_v50 = vadd.f32 %v1318_v30, %v1317_v26  ;;  %v1367_v52 = vadd.f32 %v1366_v31, %v1365_v27  ;;  %v1160_v4 = vunpack.c.l.bf16 %v1271_v34  ;;  %v1161_v10 = vunpack.c.h.bf16 %v1271_v34  ;;  %v667_v27 = vpop.permute.xlu0 %666  ;;  %v1264_v31 = vld [vmem:[%s1798_s2 + $0x18] sm:$0xff]  }
 0x103   :  { %1186 = vst [vmem:[%s1799_s4] sm:$0xff] %v1185_v32   ;;  %1284 = vst [vmem:[%s1799_s4 + $0x40] sm:$0xff] %v1225_v33   ;;  %v812_v57 = vadd.f32 %v1124_v28, %v716_v35  ;;  %v828_v58 = vadd.f32 %v1156_v29, %v732_v49  ;;  %v1132_v34 = vunpack.c.l.bf16 %v1264_v31 }
 0x104   :  { %v717_v59 = vmul.f32 %v1319_v50, %v1659_v36  ;;  %v733_v60 = vmul.f32 %v1367_v52, %v652_v54 }
 0x105   :  { %v1320_v61 = vpop.f32.mrb[8].mxu0  ;;  %v1368_v62 = vpop.f32.mrb[8].mxu1  ;;  %v844_v11 = vmax.f32 %v812_v57, 0.0  ;;  %v860_v12 = vmax.f32 %v828_v58, 0.0 }
 0x106   :  { %v813_v63 = vadd.f32 %v1125_v51, %v717_v59  ;;  %v829_v0 = vadd.f32 %v1157_v53, %v733_v60  ;;  %v1321_v1 = vpop.f32.mrb[9].mxu0  ;;  %v1369_v3 = vpop.f32.mrb[9].mxu1 }
 0x107   :  { %v1322_v5 = vadd.f32 %v1321_v1, %v1320_v61  ;;  %v1370_v6 = vadd.f32 %v1369_v3, %v1368_v62  ;;  %v1323_v7 = vpop.f32.mrb[10].mxu0  ;;  %v1371_v8 = vpop.f32.mrb[10].mxu1 }
 0x108   :  { %v845_v13 = vmax.f32 %v813_v63, 0.0  ;;  %v861_v14 = vmax.f32 %v829_v0, 0.0  ;;  %v1324_v36 = vpop.f32.mrb[11].mxu0  ;;  %v1372_v15 = vpop.f32.mrb[11].mxu1  ;;  %v1133_v0 = vunpack.c.h.bf16 %v1264_v31 }
 0x109   :  { %v718_v16 = vmul.f32 %v1322_v5, %v1661_v37  ;;  %v734_v17 = vmul.f32 %v1370_v6, %v657_v56  ;;  %v1325_v18 = vadd.f32 %v1324_v36, %v1323_v7  ;;  %v1373_v19 = vadd.f32 %v1372_v15, %v1371_v8  ;;  %v672_v3 = vpop.permute.xlu1 %671  ;;  %v677_v5 = vpop.permute.xlu0 %676 }
 0x10a   :  { %v1190_v21 = vpack.c.bf16 %v845_v13, %v844_v11  ;;  %v1230_v22 = vpack.c.bf16 %v861_v14, %v860_v12 }
 0x10b   :  { %v814_v23 = vadd.f32 %v1128_v2, %v718_v16  ;;  %v830_v24 = vadd.f32 %v1160_v4, %v734_v17  ;;  %v719_v25 = vmul.f32 %v1325_v18, %v1663_v38  ;;  %v735_v26 = vmul.f32 %v1373_v19, %v662_v20  ;;  %v1272_v38 = vld [vmem:[%s1798_s2 + $0x58] sm:$0xff]   ;;  %v1265_v4 = vld [vmem:[%s1798_s2 + $0x20] sm:$0xff]  }
 0x10c   :  { %1277 = vst [vmem:[%s1799_s4 + $0x8] sm:$0xff] %v1190_v21   ;;  %1285 = vst [vmem:[%s1799_s4 + $0x48] sm:$0xff] %v1230_v22   ;;  %v1164_v56 = vunpack.c.l.bf16 %v1272_v38  ;;  %v1165_v2 = vunpack.c.h.bf16 %v1272_v38  ;;  %v1136_v36 = vunpack.c.l.bf16 %v1265_v4  ;;  %v1137_v21 = vunpack.c.h.bf16 %v1265_v4 }
 0x10d   :  { %v815_v37 = vadd.f32 %v1129_v9, %v719_v25  ;;  %v831_v28 = vadd.f32 %v1161_v10, %v735_v26  ;;  %v1326_v29 = vpop.f32.mrb[12].mxu0  ;;  %v1374_v30 = vpop.f32.mrb[12].mxu1  ;;  %v846_v32 = vmax.f32 %v814_v23, 0.0  ;;  %v862_v33 = vmax.f32 %v830_v24, 0.0 }
 0x10e   :  { %v1327_v35 = vpop.f32.mrb[13].mxu0  ;;  %v1375_v49 = vpop.f32.mrb[13].mxu1 }
 0x10f   :  { %v847_v50 = vmax.f32 %v815_v37, 0.0  ;;  %v863_v51 = vmax.f32 %v831_v28, 0.0  ;;  %v1328_v52 = vadd.f32 %v1327_v35, %v1326_v29  ;;  %v1376_v53 = vadd.f32 %v1375_v49, %v1374_v30  ;;  %v1329_v54 = vpop.f32.mrb[14].mxu0  ;;  %v1377_v55 = vpop.f32.mrb[14].mxu1 }
 0x110   :  { %v1330_v57 = vpop.f32.mrb[15].mxu0  ;;  %v1378_v58 = vpop.f32.mrb[15].mxu1 }
 0x111   :  { %v1195_v59 = vpack.c.bf16 %v847_v50, %v846_v32  ;;  %v1235_v60 = vpack.c.bf16 %v863_v51, %v862_v33  ;;  %v720_v61 = vmul.f32 %v1328_v52, %v1665_v39  ;;  %v736_v62 = vmul.f32 %v1376_v53, %v667_v27  ;;  %v1273_v39 = vld [vmem:[%s1798_s2 + $0x60] sm:$0xff]   ;;  %v682_v31 = vpop.permute.xlu1 %681  ;;  %v687_v51 = vpop.permute.xlu0 %686 }
 0x112   :  { %v1331_v63 = vadd.f32 %v1330_v57, %v1329_v54  ;;  %v1379_v1 = vadd.f32 %v1378_v58, %v1377_v55  ;;  %v1168_v16 = vunpack.c.l.bf16 %v1273_v39  ;;  %v1169_v22 = vunpack.c.h.bf16 %v1273_v39  ;;  %v1266_v55 = vld [vmem:[%s1798_s2 + $0x28] sm:$0xff]  }
 0x113   :  { %1278 = vst [vmem:[%s1799_s4 + $0x10] sm:$0xff] %v1195_v59   ;;  %1286 = vst [vmem:[%s1799_s4 + $0x50] sm:$0xff] %v1235_v60   ;;  %v816_v6 = vadd.f32 %v1132_v34, %v720_v61  ;;  %v832_v7 = vadd.f32 %v1164_v56, %v736_v62 }
 0x114   :  { %v721_v8 = vmul.f32 %v1331_v63, %v1667_v40  ;;  %v737_v9 = vmul.f32 %v1379_v1, %v672_v3  ;;  %v1140_v1 = vunpack.c.l.bf16 %v1266_v55 }
 0x115   :  { %v1332_v10 = vpop.f32.mrb[16].mxu0  ;;  %v1380_v11 = vpop.f32.mrb[16].mxu1  ;;  %v848_v23 = vmax.f32 %v816_v6, 0.0  ;;  %v864_v24 = vmax.f32 %v832_v7, 0.0 }
 0x116   :  { %v817_v12 = vadd.f32 %v1133_v0, %v721_v8  ;;  %v833_v13 = vadd.f32 %v1165_v2, %v737_v9  ;;  %v1333_v14 = vpop.f32.mrb[17].mxu0  ;;  %v1381_v15 = vpop.f32.mrb[17].mxu1  ;;  %v1141_v9 = vunpack.c.h.bf16 %v1266_v55 }
 0x117   :  { %v1334_v17 = vadd.f32 %v1333_v14, %v1332_v10  ;;  %v1382_v18 = vadd.f32 %v1381_v15, %v1380_v11  ;;  %v1335_v19 = vpop.f32.mrb[18].mxu0  ;;  %v1383_v20 = vpop.f32.mrb[18].mxu1 }
 0x118   :  { %v849_v25 = vmax.f32 %v817_v12, 0.0  ;;  %v865_v26 = vmax.f32 %v833_v13, 0.0  ;;  %v1336_v40 = vpop.f32.mrb[19].mxu0  ;;  %v1384_v27 = vpop.f32.mrb[19].mxu1  ;;  %v1267_v13 = vld [vmem:[%s1798_s2 + $0x30] sm:$0xff]  }
 0x119   :  { %v722_v37 = vmul.f32 %v1334_v17, %v1669_v41  ;;  %v738_v28 = vmul.f32 %v1382_v18, %v677_v5  ;;  %v1337_v29 = vadd.f32 %v1336_v40, %v1335_v19  ;;  %v1385_v30 = vadd.f32 %v1384_v27, %v1383_v20  ;;  %v692_v12 = vpop.permute.xlu1 %691  ;;  %v697_v14 = vpop.permute.xlu0 %696 }
 0x11a   :  { %v1200_v38 = vpack.c.bf16 %v849_v25, %v848_v23  ;;  %v1240_v32 = vpack.c.bf16 %v865_v26, %v864_v24  ;;  %v1144_v23 = vunpack.c.l.bf16 %v1267_v13 }
 0x11b   :  { %v818_v33 = vadd.f32 %v1136_v36, %v722_v37  ;;  %v834_v35 = vadd.f32 %v1168_v16, %v738_v28  ;;  %v723_v49 = vmul.f32 %v1337_v29, %v1671_v42  ;;  %v739_v50 = vmul.f32 %v1385_v30, %v682_v31  ;;  %v1274_v42 = vld [vmem:[%s1798_s2 + $0x68] sm:$0xff]  }
 0x11c   :  { %1279 = vst [vmem:[%s1799_s4 + $0x18] sm:$0xff] %v1200_v38   ;;  %1287 = vst [vmem:[%s1799_s4 + $0x58] sm:$0xff] %v1240_v32   ;;  %v1172_v2 = vunpack.c.l.bf16 %v1274_v42  ;;  %v1173_v11 = vunpack.c.h.bf16 %v1274_v42  ;;  %v1145_v28 = vunpack.c.h.bf16 %v1267_v13 }
 0x11d   :  { %v819_v41 = vadd.f32 %v1137_v21, %v723_v49  ;;  %v835_v52 = vadd.f32 %v1169_v22, %v739_v50  ;;  %v1338_v53 = vpop.f32.mrb[20].mxu0  ;;  %v1386_v54 = vpop.f32.mrb[20].mxu1  ;;  %v850_v34 = vmax.f32 %v818_v33, 0.0  ;;  %v866_v56 = vmax.f32 %v834_v35, 0.0 }
 0x11e   :  { %v1339_v57 = vpop.f32.mrb[21].mxu0  ;;  %v1387_v58 = vpop.f32.mrb[21].mxu1 }
 0x11f   :  { %v851_v59 = vmax.f32 %v819_v41, 0.0  ;;  %v867_v60 = vmax.f32 %v835_v52, 0.0  ;;  %v1340_v61 = vadd.f32 %v1339_v57, %v1338_v53  ;;  %v1388_v62 = vadd.f32 %v1387_v58, %v1386_v54  ;;  %v1341_v63 = vpop.f32.mrb[22].mxu0  ;;  %v1389_v0 = vpop.f32.mrb[22].mxu1 }
 0x120   :  { %v1342_v3 = vpop.f32.mrb[23].mxu0  ;;  %v1390_v4 = vpop.f32.mrb[23].mxu1 }
 0x121   :  { %v1205_v39 = vpack.c.bf16 %v851_v59, %v850_v34  ;;  %v1245_v5 = vpack.c.bf16 %v867_v60, %v866_v56  ;;  %v724_v6 = vmul.f32 %v1340_v61, %v1673_v43  ;;  %v740_v7 = vmul.f32 %v1388_v62, %v687_v51  ;;  %v1275_v43 = vld [vmem:[%s1798_s2 + $0x70] sm:$0xff]   ;;  %v702_v41 = vpop.permute.xlu1 %701  ;;  %v707_v56 = vpop.permute.xlu0 %706  ;;  %v1268_v60 = vld [vmem:[%s1798_s2 + $0x38] sm:$0xff]  }
 0x122   :  { %v1343_v8 = vadd.f32 %v1342_v3, %v1341_v63  ;;  %v1391_v10 = vadd.f32 %v1390_v4, %v1389_v0  ;;  %v1176_v25 = vunpack.c.l.bf16 %v1275_v43  ;;  %v1177_v29 = vunpack.c.h.bf16 %v1275_v43 }
 0x123   :  { %1280 = vst [vmem:[%s1799_s4 + $0x20] sm:$0xff] %v1205_v39   ;;  %1288 = vst [vmem:[%s1799_s4 + $0x60] sm:$0xff] %v1245_v5   ;;  %v820_v36 = vadd.f32 %v1140_v1, %v724_v6  ;;  %v836_v15 = vadd.f32 %v1172_v2, %v740_v7  ;;  %v1148_v6 = vunpack.c.l.bf16 %v1268_v60 }
 0x124   :  { %v725_v16 = vmul.f32 %v1343_v8, %v1675_v44  ;;  %v741_v17 = vmul.f32 %v1391_v10, %v692_v12 }
 0x125   :  { %v1344_v18 = vpop.f32.mrb[24].mxu0  ;;  %v1392_v19 = vpop.f32.mrb[24].mxu1  ;;  %v852_v30 = vmax.f32 %v820_v36, 0.0  ;;  %v868_v31 = vmax.f32 %v836_v15, 0.0 }
 0x126   :  { %v821_v20 = vadd.f32 %v1141_v9, %v725_v16  ;;  %v837_v21 = vadd.f32 %v1173_v11, %v741_v17  ;;  %v1345_v22 = vpop.f32.mrb[25].mxu0  ;;  %v1393_v24 = vpop.f32.mrb[25].mxu1 }
 0x127   :  { %v1346_v26 = vadd.f32 %v1345_v22, %v1344_v18  ;;  %v1394_v40 = vadd.f32 %v1393_v24, %v1392_v19  ;;  %v1347_v27 = vpop.f32.mrb[26].mxu0  ;;  %v1395_v37 = vpop.f32.mrb[26].mxu1 }
 0x128   :  { %v853_v38 = vmax.f32 %v821_v20, 0.0  ;;  %v869_v32 = vmax.f32 %v837_v21, 0.0  ;;  %v1348_v44 = vpop.f32.mrb[27].mxu0  ;;  %v1396_v33 = vpop.f32.mrb[27].mxu1 }
 0x129   :  { %v726_v35 = vmul.f32 %v1346_v26, %v1677_v45  ;;  %v742_v49 = vmul.f32 %v1394_v40, %v697_v14  ;;  %v1349_v50 = vadd.f32 %v1348_v44, %v1347_v27  ;;  %v1397_v51 = vadd.f32 %v1396_v33, %v1395_v37  ;;  %v712_v16 = vpop.permute.xlu1 %711 }
 0x12a   :  { %v1210_v52 = vpack.c.bf16 %v853_v38, %v852_v30  ;;  %v1250_v53 = vpack.c.bf16 %v869_v32, %v868_v31  ;;  %v1149_v14 = vunpack.c.h.bf16 %v1268_v60 }
 0x12b   :  { %v822_v54 = vadd.f32 %v1144_v23, %v726_v35  ;;  %v838_v55 = vadd.f32 %v1176_v25, %v742_v49  ;;  %v727_v42 = vmul.f32 %v1349_v50, %v1679_v46  ;;  %v743_v34 = vmul.f32 %v1397_v51, %v702_v41  ;;  %v1276_v46 = vld [vmem:[%s1798_s2 + $0x78] sm:$0xff]  }
 0x12c   :  { %1281 = vst [vmem:[%s1799_s4 + $0x28] sm:$0xff] %v1210_v52   ;;  %1289 = vst [vmem:[%s1799_s4 + $0x68] sm:$0xff] %v1250_v53   ;;  %v1180_v7 = vunpack.c.l.bf16 %v1276_v46  ;;  %v1181_v15 = vunpack.c.h.bf16 %v1276_v46 }
 0x12d   :  { %v823_v45 = vadd.f32 %v1145_v28, %v727_v42  ;;  %v839_v57 = vadd.f32 %v1177_v29, %v743_v34  ;;  %v1350_v58 = vpop.f32.mrb[28].mxu0  ;;  %v1398_v59 = vpop.f32.mrb[28].mxu1  ;;  %v854_v61 = vmax.f32 %v822_v54, 0.0  ;;  %v870_v62 = vmax.f32 %v838_v55, 0.0 }
 0x12e   :  { %v1351_v63 = vpop.f32.mrb[29].mxu0  ;;  %v1399_v0 = vpop.f32.mrb[29].mxu1 }
 0x12f   :  { %v855_v1 = vmax.f32 %v823_v45, 0.0  ;;  %v871_v2 = vmax.f32 %v839_v57, 0.0  ;;  %v1352_v3 = vadd.f32 %v1351_v63, %v1350_v58  ;;  %v1400_v4 = vadd.f32 %v1399_v0, %v1398_v59  ;;  %v1353_v39 = vpop.f32.mrb[30].mxu0  ;;  %v1401_v5 = vpop.f32.mrb[30].mxu1 }
 0x130   :  { %v1354_v8 = vpop.f32.mrb[31].mxu0  ;;  %v1402_v9 = vpop.f32.mrb[31].mxu1 }
 0x131   :  { %v1215_v10 = vpack.c.bf16 %v855_v1, %v854_v61  ;;  %v1255_v11 = vpack.c.bf16 %v871_v2, %v870_v62  ;;  %v728_v12 = vmul.f32 %v1352_v3, %v1681_v47  ;;  %v744_v13 = vmul.f32 %v1400_v4, %v707_v56 }
 0x132   :  { %v1355_v43 = vadd.f32 %v1354_v8, %v1353_v39  ;;  %v1403_v36 = vadd.f32 %v1402_v9, %v1401_v5 }
 0x133   :  { %1282 = vst [vmem:[%s1799_s4 + $0x30] sm:$0xff] %v1215_v10   ;;  %1290 = vst [vmem:[%s1799_s4 + $0x70] sm:$0xff] %v1255_v11   ;;  %v824_v17 = vadd.f32 %v1148_v6, %v728_v12  ;;  %v840_v18 = vadd.f32 %v1180_v7, %v744_v13 }
 0x134   :  { %v729_v19 = vmul.f32 %v1355_v43, %v1683_v48  ;;  %v745_v20 = vmul.f32 %v1403_v36, %v712_v16 }
 0x135   :  { %v856_v22 = vmax.f32 %v824_v17, 0.0  ;;  %v872_v23 = vmax.f32 %v840_v18, 0.0 }
 0x136   :  { %v825_v47 = vadd.f32 %v1149_v14, %v729_v19  ;;  %v841_v21 = vadd.f32 %v1181_v15, %v745_v20 }
 0x138   :  { %v857_v24 = vmax.f32 %v825_v47, 0.0  ;;  %v873_v25 = vmax.f32 %v841_v21, 0.0 }
 0x13a   :  { %v1220_v26 = vpack.c.bf16 %v857_v24, %v856_v22  ;;  %v1260_v40 = vpack.c.bf16 %v873_v25, %v872_v23 }
 0x13c   :  { %1283 = vst [vmem:[%s1799_s4 + $0x38] sm:$0xff] %v1220_v26   ;;  %1291 = vst [vmem:[%s1799_s4 + $0x78] sm:$0xff] %v1260_v40  }

</bundles_post_ra>
